<compile_context>
chip_gen: v7x
topology: tpu7x:2x2x1
jax: 0.10.0
libtpu: 0.0.40
codegen_flags: <defaults>
</compile_context>

<pallas_src>
import functools

import jax
import jax.numpy as jnp
from jax.experimental import pallas as pl
from jax.experimental.pallas import tpu as pltpu

_LANE = 128


def _round_up(x, m):
    return ((x + m - 1) // m) * m


def _vmem_limit_bytes():
    # ~75% of physical per-core VMEM: 48 MiB on v7x (64 MiB phys),
    # 96 MiB on v5e/v6e (128 MiB phys), capped at 100 MiB.
    cap = 128 * 1024 * 1024
    try:
        cap = int(getattr(pltpu.get_tpu_info(), "vmem_capacity_bytes", cap))
    except Exception:
        pass
    return min(int(cap * 3 // 4), 100 * 1024 * 1024)


# ------------------------------ Pallas kernel ------------------------------- #

def _ogb_gin_fused_kernel(eps_ref, h0_ref, ea_ref, src_oh_ref, dst_oh_ref,
                          pool_oh_ref, we_ref, be_ref,
                          w1_ref, b1_ref, w2_ref, b2_ref,
                          wp_ref, bp_ref,
                          logp_ref, x1_ref, h_out_ref,
                          *, nlayer):
    """Full ogbGIN forward (all layers + readout) fused in VMEM."""
    h = h0_ref[...]                                                   # [N, Dp] f32
    ea = ea_ref[...]                                                  # [E, 8] bf16
    src_oh = src_oh_ref[...]                                          # [E, N] bf16 (exact 0/1)
    dst_oh = dst_oh_ref[...]                                          # [N, E] bf16 (exact 0/1)

    for l in range(nlayer):
        # edge_encoder Linear(7->D), bf16 MXU, f32 acc.  Computed per layer so
        # live edge-embedding VMEM is E*Dp (not E*L*Dp).
        edge_emb = jnp.dot(ea, we_ref[l],
                           preferred_element_type=jnp.float32) + be_ref[l]   # [E, Dp] f32

        # gather x_j = h[src] : bf16 one-hot matmul, f32 accumulation
        x_j = jnp.dot(src_oh, h.astype(jnp.bfloat16),
                      preferred_element_type=jnp.float32)             # [E, Dp]
        # message(x_j, edge_attr) = relu(x_j + edge_attr)
        msg = jnp.maximum(x_j + edge_emb, 0.0)

        # aggr='add' at destination nodes : bf16 one-hot matmul (scatter-add)
        agg = jnp.dot(dst_oh, msg.astype(jnp.bfloat16),
                      preferred_element_type=jnp.float32)             # [N, Dp]

        eps = eps_ref[l]                                              # SMEM scalar
        pre = (1.0 + eps) * h + agg                                   # [N, Dp] f32

        # mlp: Linear(D,2D)+BN(2D) folded -> ReLU -> Linear(2D,D)+BN(D) folded
        z = jnp.dot(pre.astype(jnp.bfloat16), w1_ref[l],
                    preferred_element_type=jnp.float32) + b1_ref[l]   # [N, H2p]
        z = jnp.maximum(z, 0.0)
        z = jnp.dot(z.astype(jnp.bfloat16), w2_ref[l],
                    preferred_element_type=jnp.float32) + b2_ref[l]   # [N, Dp]

        if l != nlayer - 1:
            z = jnp.maximum(z, 0.0)
        # F.dropout is the eval-mode identity.
        h = z

    h_out_ref[...] = h                                                # x2 (padded)

    # readout: global_add_pool + graph_pred + log_softmax (f32 softmax path)
    x1 = jnp.dot(pool_oh_ref[...], h.astype(jnp.bfloat16),
                 preferred_element_type=jnp.float32)                  # [B, Dp]
    x1_ref[...] = x1
    logits = jnp.dot(x1.astype(jnp.bfloat16), wp_ref[...],
                     preferred_element_type=jnp.float32) + bp_ref[...]  # [B, Cp] f32
    m = jnp.max(logits, axis=1, keepdims=True)
    s = logits - m
    lse = jnp.log(jnp.sum(jnp.exp(s), axis=1, keepdims=True))
    logp_ref[...] = s - lse


# --------------------------- parameter construction ------------------------- #

def _fold_bn(gamma, beta, mean, var, eps=1e-5):
    scale = gamma / jnp.sqrt(var + eps)
    shift = beta - mean * scale
    return scale[None, :].astype(jnp.float32), shift[None, :].astype(jnp.float32)


def _linear_init(key, fan_in, fan_out):
    # PyTorch nn.Linear init: U(-1/sqrt(fan_in), 1/sqrt(fan_in)); stored [in, out].
    bound = 1.0 / (fan_in ** 0.5)
    kw, kb = jax.random.split(key)
    w = jax.random.uniform(kw, (fan_in, fan_out), jnp.float32, -bound, bound)
    b = jax.random.uniform(kb, (1, fan_out), jnp.float32, -bound, bound)
    return w, b


def init_params(key, nhid, nlayer, nclass):
    keys = jax.random.split(key, nlayer + 2)
    node_emb = jax.random.normal(keys[0], (1, nhid), jnp.float32)   # Embedding(1, nhid)
    layers = []
    for l in range(nlayer):
        k0, k1, k2 = jax.random.split(keys[1 + l], 3)
        we, be = _linear_init(k0, 7, nhid)               # edge_encoder
        w1, b1 = _linear_init(k1, nhid, 2 * nhid)        # mlp[0]
        w2, b2 = _linear_init(k2, 2 * nhid, nhid)        # mlp[3]
        # BatchNorm1d at PyTorch defaults (gamma=1, beta=0, mean=0, var=1), folded
        s1, t1 = _fold_bn(jnp.ones(2 * nhid), jnp.zeros(2 * nhid),
                          jnp.zeros(2 * nhid), jnp.ones(2 * nhid))
        s2, t2 = _fold_bn(jnp.ones(nhid), jnp.zeros(nhid),
                          jnp.zeros(nhid), jnp.ones(nhid))
        layers.append(dict(eps=jnp.zeros((), jnp.float32),
                           we=we, be=be, w1=w1, b1=b1, s1=s1, t1=t1,
                           w2=w2, b2=b2, s2=s2, t2=t2))
    wp, bp = _linear_init(keys[-1], nhid, nclass)        # graph_pred
    return dict(node_emb=node_emb, layers=layers, graph_pred=(wp, bp))


def _pack_params(params):
    """Pad feature dims to 128 lanes, fold BN into Linear weights, cast weights bf16."""
    nhid = params["node_emb"].shape[1]
    wp, bp = params["graph_pred"]
    nclass = wp.shape[1]
    layers = params["layers"]
    nlayer = len(layers)
    d_pad = _round_up(nhid, _LANE)
    h2_pad = _round_up(2 * nhid, _LANE)
    c_pad = _round_up(nclass, _LANE)

    def pad2(a, rows, cols, fill=0.0):
        out = jnp.full((rows, cols), fill, jnp.float32)
        return out.at[:a.shape[0], :a.shape[1]].set(a.astype(jnp.float32))

    we_s, be_s, w1_s, b1_s, w2_s, b2_s, eps = [], [], [], [], [], [], []
    for lp in layers:
        # fold eval-mode BN affines into the adjacent Linear layers
        w1f = lp["w1"] * lp["s1"]                     # [nhid, 2nhid]
        b1f = lp["b1"] * lp["s1"] + lp["t1"]          # [1, 2nhid]
        w2f = lp["w2"] * lp["s2"]                     # [2nhid, nhid]
        b2f = lp["b2"] * lp["s2"] + lp["t2"]          # [1, nhid]

        we_s.append(pad2(lp["we"], 8, d_pad).astype(jnp.bfloat16))
        be_s.append(pad2(lp["be"], 1, d_pad))
        w1_s.append(pad2(w1f, d_pad, h2_pad).astype(jnp.bfloat16))
        b1_s.append(pad2(b1f, 1, h2_pad))
        w2_s.append(pad2(w2f, h2_pad, d_pad).astype(jnp.bfloat16))
        b2_s.append(pad2(b2f, 1, d_pad))
        eps.append(lp["eps"])

    return dict(
        eps=jnp.stack(eps).astype(jnp.float32),            # [L]   SMEM scalars
        node_emb=pad2(params["node_emb"], 1, d_pad),        # [1, Dp] f32
        we=jnp.stack(we_s), be=jnp.stack(be_s),             # [L,8,Dp] bf16, [L,1,Dp] f32
        w1=jnp.stack(w1_s), b1=jnp.stack(b1_s),             # [L,Dp,H2p] bf16, [L,1,H2p] f32
        w2=jnp.stack(w2_s), b2=jnp.stack(b2_s),             # [L,H2p,Dp] bf16, [L,1,Dp] f32
        wp=pad2(wp, d_pad, c_pad).astype(jnp.bfloat16),     # [Dp, Cp] bf16
        bp=pad2(bp, 1, c_pad, fill=-1e30),                  # f32; pad classes masked for log_softmax
        dims=(d_pad, h2_pad, c_pad, nlayer),
    )


# --------------------------------- forward ---------------------------------- #

def ogb_gin_forward(params, x_idx, edge_index, edge_attr, batch, num_graphs):
    N = x_idx.shape[0]
    E = edge_index.shape[1]
    B = num_graphs
    nhid = params["node_emb"].shape[1]
    nclass = params["graph_pred"][0].shape[1]

    pk = _pack_params(params)
    d_pad, h2_pad, c_pad, nlayer = pk["dims"]

    # node_encoder: Embedding(1, D) lookup (glue), padded to Dp lanes
    h0 = pk["node_emb"][x_idx]                                          # [N, Dp] f32
    # edge_attr padded K=7 -> 8, bf16 MXU operand
    ea = jnp.zeros((E, 8), jnp.bfloat16).at[:, :7].set(edge_attr.astype(jnp.bfloat16))

    # one-hot gather / scatter-add / pooling operands in bf16 (0/1 exact).
    # dst/pool are built ALREADY transposed via iota comparison (no XLA transpose).
    node_ids = jnp.arange(N, dtype=jnp.int32)
    src_oh = (edge_index[0][:, None] == node_ids[None, :]).astype(jnp.bfloat16)   # [E, N]
    dst_oh = (node_ids[:, None] == edge_index[1][None, :]).astype(jnp.bfloat16)   # [N, E]
    pool_oh = (jnp.arange(B, dtype=jnp.int32)[:, None] == batch[None, :]
               ).astype(jnp.bfloat16)                                             # [B, N]

    operands = (pk["eps"], h0, ea, src_oh, dst_oh, pool_oh,
                pk["we"], pk["be"],
                pk["w1"], pk["b1"], pk["w2"], pk["b2"],
                pk["wp"], pk["bp"])

    # advisory cost estimate for XLA's scheduler
    flops = nlayer * (2 * E * 8 * d_pad                                  # edge encoder
                      + 2 * E * N * d_pad + 2 * N * E * d_pad            # gather + scatter
                      + 2 * N * d_pad * h2_pad + 2 * N * h2_pad * d_pad)  # mlp
    flops += 2 * B * N * d_pad + 2 * B * d_pad * c_pad                   # pool + graph_pred
    transcendentals = B * c_pad + B
    bytes_accessed = int(sum(x.size * x.dtype.itemsize for x in operands)
                         + 4 * (B * c_pad + B * d_pad + N * d_pad))

    kernel = functools.partial(_ogb_gin_fused_kernel, nlayer=nlayer)
    logp_p, x1_p, h_p = pl.pallas_call(
        kernel,
        out_shape=(jax.ShapeDtypeStruct((B, c_pad), jnp.float32),
                   jax.ShapeDtypeStruct((B, d_pad), jnp.float32),
                   jax.ShapeDtypeStruct((N, d_pad), jnp.float32)),
        in_specs=[pl.BlockSpec(memory_space=pltpu.MemorySpace.SMEM)]         # eps scalars
                 + [pl.BlockSpec(memory_space=pltpu.MemorySpace.VMEM)] * 13,
        out_specs=(pl.BlockSpec(memory_space=pltpu.MemorySpace.VMEM),) * 3,
        compiler_params=pltpu.CompilerParams(vmem_limit_bytes=_vmem_limit_bytes()),
        cost_estimate=pl.CostEstimate(flops=int(flops),
                                      transcendentals=int(transcendentals),
                                      bytes_accessed=bytes_accessed),
    )(*operands)

    # slice the 128-lane padding back off
    return logp_p[:, :nclass], x1_p[:, :nhid], h_p[:, :nhid]


# ----------------------------- pure-JAX reference ---------------------------- #

def _reference_forward(params, x_idx, edge_index, edge_attr, batch, num_graphs):
    h = params["node_emb"][x_idx].astype(jnp.float32)
    N = h.shape[0]
    src_oh = jax.nn.one_hot(edge_index[0], N, dtype=jnp.float32)
    dst_oh = jax.nn.one_hot(edge_index[1], N, dtype=jnp.float32).T
    pool_oh = jax.nn.one_hot(batch, num_graphs, dtype=jnp.float32).T
    nlayer = len(params["layers"])
    for l, lp in enumerate(params["layers"]):
        edge_emb = edge_attr.astype(jnp.float32) @ lp["we"] + lp["be"]
        msg = jnp.maximum(src_oh @ h + edge_emb, 0.0)
        agg = dst_oh @ msg
        pre = (1.0 + lp["eps"]) * h + agg
        z = pre @ lp["w1"] + lp["b1"]
        z = jnp.maximum(z * lp["s1"] + lp["t1"], 0.0)
        z = z @ lp["w2"] + lp["b2"]
        z = z * lp["s2"] + lp["t2"]
        if l != nlayer - 1:
            z = jnp.maximum(z, 0.0)
        h = z
    wp, bp = params["graph_pred"]
    x1 = pool_oh @ h
    logits = x1 @ wp + bp
    return jax.nn.log_softmax(logits, axis=1), x1, h


# ----------------------------------- main ------------------------------------ #

if __name__ == "__main__":
    key = jax.random.PRNGKey(0)
    N, E, B = 16, 32, 2                      # nodes, edges, graphs in the batch
    nhid, nlayer, nclass = 32, 3, 4

    k_param, k_ei, k_ea = jax.random.split(key, 3)
    params = init_params(k_param, nhid, nlayer, nclass)

    x_idx = jnp.zeros((N,), jnp.int32)       # Embedding(1, D) -> all idx 0
    edge_index = jax.random.randint(k_ei, (2, E), 0, N, dtype=jnp.int32)
    edge_attr = jax.random.normal(k_ea, (E, 7), jnp.float32)
    batch = jnp.concatenate([jnp.zeros(N // 2, jnp.int32),
                             jnp.ones(N - N // 2, jnp.int32)])

    logp, x1, x2 = ogb_gin_forward(params, x_idx, edge_index, edge_attr, batch, B)
    jax.block_until_ready((logp, x1, x2))

    assert logp.shape == (B, nclass)
    assert x1.shape == (B, nhid)
    assert x2.shape == (N, nhid)

    # correctness vs. pure-JAX f32 reference; all matmuls now use bf16 operands
    # (f32 accumulation), so tolerance is loose.
    logp_r, x1_r, x2_r = _reference_forward(params, x_idx, edge_index,
                                            edge_attr, batch, B)
    assert jnp.allclose(logp, logp_r, atol=1e-1, rtol=5e-2)
    assert jnp.allclose(x1, x1_r, atol=1e-1, rtol=5e-2)
    assert jnp.allclose(x2, x2_r, atol=1e-1, rtol=5e-2)

    print("KERNEL_OK")
</pallas_src>

<mosaic_0001>
module attributes {stable_mosaic.version = 11 : i64} {
  func.func @_ogb_gin_fused_kernel(%arg0: memref<3xf32, #tpu.memory_space<smem>>, %arg1: memref<16x128xf32, #tpu.memory_space<vmem>>, %arg2: memref<32x8xbf16, #tpu.memory_space<vmem>>, %arg3: memref<32x16xbf16, #tpu.memory_space<vmem>>, %arg4: memref<16x32xbf16, #tpu.memory_space<vmem>>, %arg5: memref<2x16xbf16, #tpu.memory_space<vmem>>, %arg6: memref<3x8x128xbf16, #tpu.memory_space<vmem>>, %arg7: memref<3x1x128xf32, #tpu.memory_space<vmem>>, %arg8: memref<3x128x128xbf16, #tpu.memory_space<vmem>>, %arg9: memref<3x1x128xf32, #tpu.memory_space<vmem>>, %arg10: memref<3x128x128xbf16, #tpu.memory_space<vmem>>, %arg11: memref<3x1x128xf32, #tpu.memory_space<vmem>>, %arg12: memref<128x128xbf16, #tpu.memory_space<vmem>>, %arg13: memref<1x128xf32, #tpu.memory_space<vmem>>, %arg14: memref<2x128xf32, #tpu.memory_space<vmem>>, %arg15: memref<2x128xf32, #tpu.memory_space<vmem>>, %arg16: memref<16x128xf32, #tpu.memory_space<vmem>>) attributes {dimension_semantics = [], scalar_prefetch = 0 : i64, scratch_operands = 0 : i64, tpu.core_type = #tpu.core_type<tc>} {
    %c0 = arith.constant 0 : index
    %c0_0 = arith.constant 0 : index
    %0 = vector.load %arg1[%c0, %c0_0] : memref<16x128xf32, #tpu.memory_space<vmem>>, vector<16x128xf32>
    %c0_1 = arith.constant 0 : index
    %c0_2 = arith.constant 0 : index
    %1 = vector.load %arg2[%c0_1, %c0_2] : memref<32x8xbf16, #tpu.memory_space<vmem>>, vector<32x8xbf16>
    %c0_3 = arith.constant 0 : index
    %c0_4 = arith.constant 0 : index
    %2 = vector.load %arg3[%c0_3, %c0_4] : memref<32x16xbf16, #tpu.memory_space<vmem>>, vector<32x16xbf16>
    %c0_5 = arith.constant 0 : index
    %c0_6 = arith.constant 0 : index
    %3 = vector.load %arg4[%c0_5, %c0_6] : memref<16x32xbf16, #tpu.memory_space<vmem>>, vector<16x32xbf16>
    %c0_7 = arith.constant 0 : index
    %c0_8 = arith.constant 0 : index
    %c0_9 = arith.constant 0 : index
    %4 = vector.load %arg6[%c0_7, %c0_8, %c0_9] : memref<3x8x128xbf16, #tpu.memory_space<vmem>>, vector<1x8x128xbf16>
    %5 = vector.shape_cast %4 : vector<1x8x128xbf16> to vector<8x128xbf16>
    %cst = arith.constant dense<0.000000e+00> : vector<32x128xf32>
    %6 = tpu.matmul %1, %5, %cst {dimension_numbers = #tpu.dot_dimension_numbers<[1], [0], [0], [1], [0, 0, 1, 1], [], []>} : vector<32x8xbf16>, vector<8x128xbf16>, vector<32x128xf32> -> vector<32x128xf32>
    %c0_10 = arith.constant 0 : index
    %c0_11 = arith.constant 0 : index
    %c0_12 = arith.constant 0 : index
    %7 = vector.load %arg7[%c0_10, %c0_11, %c0_12] : memref<3x1x128xf32, #tpu.memory_space<vmem>>, vector<1x1x128xf32>
    %8 = vector.shape_cast %7 : vector<1x1x128xf32> to vector<1x128xf32>
    %9 = vector.broadcast %8 : vector<1x128xf32> to vector<32x128xf32>
    %10 = arith.addf %6, %9 : vector<32x128xf32>
    %11 = arith.truncf %0 : vector<16x128xf32> to vector<16x128xbf16>
    %cst_13 = arith.constant dense<0.000000e+00> : vector<32x128xf32>
    %12 = tpu.matmul %2, %11, %cst_13 {dimension_numbers = #tpu.dot_dimension_numbers<[1], [0], [0], [1], [0, 0, 1, 1], [], []>} : vector<32x16xbf16>, vector<16x128xbf16>, vector<32x128xf32> -> vector<32x128xf32>
    %13 = arith.addf %12, %10 : vector<32x128xf32>
    %cst_14 = arith.constant 0.000000e+00 : f32
    %14 = vector.broadcast %cst_14 : f32 to vector<32x128xf32>
    %15 = arith.maximumf %13, %14 : vector<32x128xf32>
    %16 = arith.truncf %15 : vector<32x128xf32> to vector<32x128xbf16>
    %cst_15 = arith.constant dense<0.000000e+00> : vector<16x128xf32>
    %17 = tpu.matmul %3, %16, %cst_15 {dimension_numbers = #tpu.dot_dimension_numbers<[1], [0], [0], [1], [0, 0, 1, 1], [], []>} : vector<16x32xbf16>, vector<32x128xbf16>, vector<16x128xf32> -> vector<16x128xf32>
    %c0_16 = arith.constant 0 : index
    %18 = memref.load %arg0[%c0_16] : memref<3xf32, #tpu.memory_space<smem>>
    %cst_17 = arith.constant 1.000000e+00 : f32
    %19 = arith.addf %cst_17, %18 : f32
    %20 = vector.broadcast %19 : f32 to vector<16x128xf32>
    %21 = arith.mulf %20, %0 : vector<16x128xf32>
    %22 = arith.addf %21, %17 : vector<16x128xf32>
    %23 = arith.truncf %22 : vector<16x128xf32> to vector<16x128xbf16>
    %c0_18 = arith.constant 0 : index
    %c0_19 = arith.constant 0 : index
    %c0_20 = arith.constant 0 : index
    %24 = vector.load %arg8[%c0_18, %c0_19, %c0_20] : memref<3x128x128xbf16, #tpu.memory_space<vmem>>, vector<1x128x128xbf16>
    %25 = vector.shape_cast %24 : vector<1x128x128xbf16> to vector<128x128xbf16>
    %cst_21 = arith.constant dense<0.000000e+00> : vector<16x128xf32>
    %26 = tpu.matmul %23, %25, %cst_21 {dimension_numbers = #tpu.dot_dimension_numbers<[1], [0], [0], [1], [0, 0, 1, 1], [], []>} : vector<16x128xbf16>, vector<128x128xbf16>, vector<16x128xf32> -> vector<16x128xf32>
    %c0_22 = arith.constant 0 : index
    %c0_23 = arith.constant 0 : index
    %c0_24 = arith.constant 0 : index
    %27 = vector.load %arg9[%c0_22, %c0_23, %c0_24] : memref<3x1x128xf32, #tpu.memory_space<vmem>>, vector<1x1x128xf32>
    %28 = vector.shape_cast %27 : vector<1x1x128xf32> to vector<1x128xf32>
    %29 = vector.broadcast %28 : vector<1x128xf32> to vector<16x128xf32>
    %30 = arith.addf %26, %29 : vector<16x128xf32>
    %cst_25 = arith.constant 0.000000e+00 : f32
    %31 = vector.broadcast %cst_25 : f32 to vector<16x128xf32>
    %32 = arith.maximumf %30, %31 : vector<16x128xf32>
    %33 = arith.truncf %32 : vector<16x128xf32> to vector<16x128xbf16>
    %c0_26 = arith.constant 0 : index
    %c0_27 = arith.constant 0 : index
    %c0_28 = arith.constant 0 : index
    %34 = vector.load %arg10[%c0_26, %c0_27, %c0_28] : memref<3x128x128xbf16, #tpu.memory_space<vmem>>, vector<1x128x128xbf16>
    %35 = vector.shape_cast %34 : vector<1x128x128xbf16> to vector<128x128xbf16>
    %cst_29 = arith.constant dense<0.000000e+00> : vector<16x128xf32>
    %36 = tpu.matmul %33, %35, %cst_29 {dimension_numbers = #tpu.dot_dimension_numbers<[1], [0], [0], [1], [0, 0, 1, 1], [], []>} : vector<16x128xbf16>, vector<128x128xbf16>, vector<16x128xf32> -> vector<16x128xf32>
    %c0_30 = arith.constant 0 : index
    %c0_31 = arith.constant 0 : index
    %c0_32 = arith.constant 0 : index
    %37 = vector.load %arg11[%c0_30, %c0_31, %c0_32] : memref<3x1x128xf32, #tpu.memory_space<vmem>>, vector<1x1x128xf32>
    %38 = vector.shape_cast %37 : vector<1x1x128xf32> to vector<1x128xf32>
    %39 = vector.broadcast %38 : vector<1x128xf32> to vector<16x128xf32>
    %40 = arith.addf %36, %39 : vector<16x128xf32>
    %cst_33 = arith.constant 0.000000e+00 : f32
    %41 = vector.broadcast %cst_33 : f32 to vector<16x128xf32>
    %42 = arith.maximumf %40, %41 : vector<16x128xf32>
    %c1 = arith.constant 1 : index
    %c0_34 = arith.constant 0 : index
    %c0_35 = arith.constant 0 : index
    %43 = vector.load %arg6[%c1, %c0_34, %c0_35] : memref<3x8x128xbf16, #tpu.memory_space<vmem>>, vector<1x8x128xbf16>
    %44 = vector.shape_cast %43 : vector<1x8x128xbf16> to vector<8x128xbf16>
    %cst_36 = arith.constant dense<0.000000e+00> : vector<32x128xf32>
    %45 = tpu.matmul %1, %44, %cst_36 {dimension_numbers = #tpu.dot_dimension_numbers<[1], [0], [0], [1], [0, 0, 1, 1], [], []>} : vector<32x8xbf16>, vector<8x128xbf16>, vector<32x128xf32> -> vector<32x128xf32>
    %c1_37 = arith.constant 1 : index
    %c0_38 = arith.constant 0 : index
    %c0_39 = arith.constant 0 : index
    %46 = vector.load %arg7[%c1_37, %c0_38, %c0_39] : memref<3x1x128xf32, #tpu.memory_space<vmem>>, vector<1x1x128xf32>
    %47 = vector.shape_cast %46 : vector<1x1x128xf32> to vector<1x128xf32>
    %48 = vector.broadcast %47 : vector<1x128xf32> to vector<32x128xf32>
    %49 = arith.addf %45, %48 : vector<32x128xf32>
    %50 = arith.truncf %42 : vector<16x128xf32> to vector<16x128xbf16>
    %cst_40 = arith.constant dense<0.000000e+00> : vector<32x128xf32>
    %51 = tpu.matmul %2, %50, %cst_40 {dimension_numbers = #tpu.dot_dimension_numbers<[1], [0], [0], [1], [0, 0, 1, 1], [], []>} : vector<32x16xbf16>, vector<16x128xbf16>, vector<32x128xf32> -> vector<32x128xf32>
    %52 = arith.addf %51, %49 : vector<32x128xf32>
    %cst_41 = arith.constant 0.000000e+00 : f32
    %53 = vector.broadcast %cst_41 : f32 to vector<32x128xf32>
    %54 = arith.maximumf %52, %53 : vector<32x128xf32>
    %55 = arith.truncf %54 : vector<32x128xf32> to vector<32x128xbf16>
    %cst_42 = arith.constant dense<0.000000e+00> : vector<16x128xf32>
    %56 = tpu.matmul %3, %55, %cst_42 {dimension_numbers = #tpu.dot_dimension_numbers<[1], [0], [0], [1], [0, 0, 1, 1], [], []>} : vector<16x32xbf16>, vector<32x128xbf16>, vector<16x128xf32> -> vector<16x128xf32>
    %c1_43 = arith.constant 1 : index
    %57 = memref.load %arg0[%c1_43] : memref<3xf32, #tpu.memory_space<smem>>
    %cst_44 = arith.constant 1.000000e+00 : f32
    %58 = arith.addf %cst_44, %57 : f32
    %59 = vector.broadcast %58 : f32 to vector<16x128xf32>
    %60 = arith.mulf %59, %42 : vector<16x128xf32>
    %61 = arith.addf %60, %56 : vector<16x128xf32>
    %62 = arith.truncf %61 : vector<16x128xf32> to vector<16x128xbf16>
    %c1_45 = arith.constant 1 : index
    %c0_46 = arith.constant 0 : index
    %c0_47 = arith.constant 0 : index
    %63 = vector.load %arg8[%c1_45, %c0_46, %c0_47] : memref<3x128x128xbf16, #tpu.memory_space<vmem>>, vector<1x128x128xbf16>
    %64 = vector.shape_cast %63 : vector<1x128x128xbf16> to vector<128x128xbf16>
    %cst_48 = arith.constant dense<0.000000e+00> : vector<16x128xf32>
    %65 = tpu.matmul %62, %64, %cst_48 {dimension_numbers = #tpu.dot_dimension_numbers<[1], [0], [0], [1], [0, 0, 1, 1], [], []>} : vector<16x128xbf16>, vector<128x128xbf16>, vector<16x128xf32> -> vector<16x128xf32>
    %c1_49 = arith.constant 1 : index
    %c0_50 = arith.constant 0 : index
    %c0_51 = arith.constant 0 : index
    %66 = vector.load %arg9[%c1_49, %c0_50, %c0_51] : memref<3x1x128xf32, #tpu.memory_space<vmem>>, vector<1x1x128xf32>
    %67 = vector.shape_cast %66 : vector<1x1x128xf32> to vector<1x128xf32>
    %68 = vector.broadcast %67 : vector<1x128xf32> to vector<16x128xf32>
    %69 = arith.addf %65, %68 : vector<16x128xf32>
    %cst_52 = arith.constant 0.000000e+00 : f32
    %70 = vector.broadcast %cst_52 : f32 to vector<16x128xf32>
    %71 = arith.maximumf %69, %70 : vector<16x128xf32>
    %72 = arith.truncf %71 : vector<16x128xf32> to vector<16x128xbf16>
    %c1_53 = arith.constant 1 : index
    %c0_54 = arith.constant 0 : index
    %c0_55 = arith.constant 0 : index
    %73 = vector.load %arg10[%c1_53, %c0_54, %c0_55] : memref<3x128x128xbf16, #tpu.memory_space<vmem>>, vector<1x128x128xbf16>
    %74 = vector.shape_cast %73 : vector<1x128x128xbf16> to vector<128x128xbf16>
    %cst_56 = arith.constant dense<0.000000e+00> : vector<16x128xf32>
    %75 = tpu.matmul %72, %74, %cst_56 {dimension_numbers = #tpu.dot_dimension_numbers<[1], [0], [0], [1], [0, 0, 1, 1], [], []>} : vector<16x128xbf16>, vector<128x128xbf16>, vector<16x128xf32> -> vector<16x128xf32>
    %c1_57 = arith.constant 1 : index
    %c0_58 = arith.constant 0 : index
    %c0_59 = arith.constant 0 : index
    %76 = vector.load %arg11[%c1_57, %c0_58, %c0_59] : memref<3x1x128xf32, #tpu.memory_space<vmem>>, vector<1x1x128xf32>
    %77 = vector.shape_cast %76 : vector<1x1x128xf32> to vector<1x128xf32>
    %78 = vector.broadcast %77 : vector<1x128xf32> to vector<16x128xf32>
    %79 = arith.addf %75, %78 : vector<16x128xf32>
    %cst_60 = arith.constant 0.000000e+00 : f32
    %80 = vector.broadcast %cst_60 : f32 to vector<16x128xf32>
    %81 = arith.maximumf %79, %80 : vector<16x128xf32>
    %c2 = arith.constant 2 : index
    %c0_61 = arith.constant 0 : index
    %c0_62 = arith.constant 0 : index
    %82 = vector.load %arg6[%c2, %c0_61, %c0_62] : memref<3x8x128xbf16, #tpu.memory_space<vmem>>, vector<1x8x128xbf16>
    %83 = vector.shape_cast %82 : vector<1x8x128xbf16> to vector<8x128xbf16>
    %cst_63 = arith.constant dense<0.000000e+00> : vector<32x128xf32>
    %84 = tpu.matmul %1, %83, %cst_63 {dimension_numbers = #tpu.dot_dimension_numbers<[1], [0], [0], [1], [0, 0, 1, 1], [], []>} : vector<32x8xbf16>, vector<8x128xbf16>, vector<32x128xf32> -> vector<32x128xf32>
    %c2_64 = arith.constant 2 : index
    %c0_65 = arith.constant 0 : index
    %c0_66 = arith.constant 0 : index
    %85 = vector.load %arg7[%c2_64, %c0_65, %c0_66] : memref<3x1x128xf32, #tpu.memory_space<vmem>>, vector<1x1x128xf32>
    %86 = vector.shape_cast %85 : vector<1x1x128xf32> to vector<1x128xf32>
    %87 = vector.broadcast %86 : vector<1x128xf32> to vector<32x128xf32>
    %88 = arith.addf %84, %87 : vector<32x128xf32>
    %89 = arith.truncf %81 : vector<16x128xf32> to vector<16x128xbf16>
    %cst_67 = arith.constant dense<0.000000e+00> : vector<32x128xf32>
    %90 = tpu.matmul %2, %89, %cst_67 {dimension_numbers = #tpu.dot_dimension_numbers<[1], [0], [0], [1], [0, 0, 1, 1], [], []>} : vector<32x16xbf16>, vector<16x128xbf16>, vector<32x128xf32> -> vector<32x128xf32>
    %91 = arith.addf %90, %88 : vector<32x128xf32>
    %cst_68 = arith.constant 0.000000e+00 : f32
    %92 = vector.broadcast %cst_68 : f32 to vector<32x128xf32>
    %93 = arith.maximumf %91, %92 : vector<32x128xf32>
    %94 = arith.truncf %93 : vector<32x128xf32> to vector<32x128xbf16>
    %cst_69 = arith.constant dense<0.000000e+00> : vector<16x128xf32>
    %95 = tpu.matmul %3, %94, %cst_69 {dimension_numbers = #tpu.dot_dimension_numbers<[1], [0], [0], [1], [0, 0, 1, 1], [], []>} : vector<16x32xbf16>, vector<32x128xbf16>, vector<16x128xf32> -> vector<16x128xf32>
    %c2_70 = arith.constant 2 : index
    %96 = memref.load %arg0[%c2_70] : memref<3xf32, #tpu.memory_space<smem>>
    %cst_71 = arith.constant 1.000000e+00 : f32
    %97 = arith.addf %cst_71, %96 : f32
    %98 = vector.broadcast %97 : f32 to vector<16x128xf32>
    %99 = arith.mulf %98, %81 : vector<16x128xf32>
    %100 = arith.addf %99, %95 : vector<16x128xf32>
    %101 = arith.truncf %100 : vector<16x128xf32> to vector<16x128xbf16>
    %c2_72 = arith.constant 2 : index
    %c0_73 = arith.constant 0 : index
    %c0_74 = arith.constant 0 : index
    %102 = vector.load %arg8[%c2_72, %c0_73, %c0_74] : memref<3x128x128xbf16, #tpu.memory_space<vmem>>, vector<1x128x128xbf16>
    %103 = vector.shape_cast %102 : vector<1x128x128xbf16> to vector<128x128xbf16>
    %cst_75 = arith.constant dense<0.000000e+00> : vector<16x128xf32>
    %104 = tpu.matmul %101, %103, %cst_75 {dimension_numbers = #tpu.dot_dimension_numbers<[1], [0], [0], [1], [0, 0, 1, 1], [], []>} : vector<16x128xbf16>, vector<128x128xbf16>, vector<16x128xf32> -> vector<16x128xf32>
    %c2_76 = arith.constant 2 : index
    %c0_77 = arith.constant 0 : index
    %c0_78 = arith.constant 0 : index
    %105 = vector.load %arg9[%c2_76, %c0_77, %c0_78] : memref<3x1x128xf32, #tpu.memory_space<vmem>>, vector<1x1x128xf32>
    %106 = vector.shape_cast %105 : vector<1x1x128xf32> to vector<1x128xf32>
    %107 = vector.broadcast %106 : vector<1x128xf32> to vector<16x128xf32>
    %108 = arith.addf %104, %107 : vector<16x128xf32>
    %cst_79 = arith.constant 0.000000e+00 : f32
    %109 = vector.broadcast %cst_79 : f32 to vector<16x128xf32>
    %110 = arith.maximumf %108, %109 : vector<16x128xf32>
    %111 = arith.truncf %110 : vector<16x128xf32> to vector<16x128xbf16>
    %c2_80 = arith.constant 2 : index
    %c0_81 = arith.constant 0 : index
    %c0_82 = arith.constant 0 : index
    %112 = vector.load %arg10[%c2_80, %c0_81, %c0_82] : memref<3x128x128xbf16, #tpu.memory_space<vmem>>, vector<1x128x128xbf16>
    %113 = vector.shape_cast %112 : vector<1x128x128xbf16> to vector<128x128xbf16>
    %cst_83 = arith.constant dense<0.000000e+00> : vector<16x128xf32>
    %114 = tpu.matmul %111, %113, %cst_83 {dimension_numbers = #tpu.dot_dimension_numbers<[1], [0], [0], [1], [0, 0, 1, 1], [], []>} : vector<16x128xbf16>, vector<128x128xbf16>, vector<16x128xf32> -> vector<16x128xf32>
    %c2_84 = arith.constant 2 : index
    %c0_85 = arith.constant 0 : index
    %c0_86 = arith.constant 0 : index
    %115 = vector.load %arg11[%c2_84, %c0_85, %c0_86] : memref<3x1x128xf32, #tpu.memory_space<vmem>>, vector<1x1x128xf32>
    %116 = vector.shape_cast %115 : vector<1x1x128xf32> to vector<1x128xf32>
    %117 = vector.broadcast %116 : vector<1x128xf32> to vector<16x128xf32>
    %118 = arith.addf %114, %117 : vector<16x128xf32>
    %c0_87 = arith.constant 0 : index
    %c0_88 = arith.constant 0 : index
    %119 = vector.load %arg16[%c0_87, %c0_88] : memref<16x128xf32, #tpu.memory_space<vmem>>, vector<16x128xf32>
    tpu.vector_store %arg16[%c0_87, %c0_88], %118 {strides = array<i32>} : memref<16x128xf32, #tpu.memory_space<vmem>>, vector<16x128xf32>,
    %c0_89 = arith.constant 0 : index
    %c0_90 = arith.constant 0 : index
    %120 = vector.load %arg5[%c0_89, %c0_90] : memref<2x16xbf16, #tpu.memory_space<vmem>>, vector<2x16xbf16>
    %121 = arith.truncf %118 : vector<16x128xf32> to vector<16x128xbf16>
    %cst_91 = arith.constant dense<0.000000e+00> : vector<2x128xf32>
    %122 = tpu.matmul %120, %121, %cst_91 {dimension_numbers = #tpu.dot_dimension_numbers<[1], [0], [0], [1], [0, 0, 1, 1], [], []>} : vector<2x16xbf16>, vector<16x128xbf16>, vector<2x128xf32> -> vector<2x128xf32>
    %c0_92 = arith.constant 0 : index
    %c0_93 = arith.constant 0 : index
    %123 = vector.load %arg15[%c0_92, %c0_93] : memref<2x128xf32, #tpu.memory_space<vmem>>, vector<2x128xf32>
    tpu.vector_store %arg15[%c0_92, %c0_93], %122 {strides = array<i32>} : memref<2x128xf32, #tpu.memory_space<vmem>>, vector<2x128xf32>,
    %124 = arith.truncf %122 : vector<2x128xf32> to vector<2x128xbf16>
    %c0_94 = arith.constant 0 : index
    %c0_95 = arith.constant 0 : index
    %125 = vector.load %arg12[%c0_94, %c0_95] : memref<128x128xbf16, #tpu.memory_space<vmem>>, vector<128x128xbf16>
    %cst_96 = arith.constant dense<0.000000e+00> : vector<2x128xf32>
    %126 = tpu.matmul %124, %125, %cst_96 {dimension_numbers = #tpu.dot_dimension_numbers<[1], [0], [0], [1], [0, 0, 1, 1], [], []>} : vector<2x128xbf16>, vector<128x128xbf16>, vector<2x128xf32> -> vector<2x128xf32>
    %c0_97 = arith.constant 0 : index
    %c0_98 = arith.constant 0 : index
    %127 = vector.load %arg13[%c0_97, %c0_98] : memref<1x128xf32, #tpu.memory_space<vmem>>, vector<1x128xf32>
    %128 = vector.broadcast %127 : vector<1x128xf32> to vector<2x128xf32>
    %129 = arith.addf %126, %128 : vector<2x128xf32>
    %cst_99 = arith.constant dense<0xFF800000> : vector<2xf32>
    %130 = vector.multi_reduction <maximumf>, %129, %cst_99 [1] : vector<2x128xf32> to vector<2xf32>
    %131 = vector.shape_cast %130 : vector<2xf32> to vector<2x1xf32>
    %132 = vector.broadcast %131 : vector<2x1xf32> to vector<2x128xf32>
    %133 = arith.subf %129, %132 : vector<2x128xf32>
    %134 = math.exp %133 : vector<2x128xf32>
    %cst_100 = arith.constant dense<0.000000e+00> : vector<2xf32>
    %135 = vector.multi_reduction <add>, %134, %cst_100 [1] : vector<2x128xf32> to vector<2xf32>
    %136 = vector.shape_cast %135 : vector<2xf32> to vector<2x1xf32>
    %137 = math.log %136 : vector<2x1xf32>
    %138 = vector.broadcast %137 : vector<2x1xf32> to vector<2x128xf32>
    %139 = arith.subf %133, %138 : vector<2x128xf32>
    %c0_101 = arith.constant 0 : index
    %c0_102 = arith.constant 0 : index
    %140 = vector.load %arg14[%c0_101, %c0_102] : memref<2x128xf32, #tpu.memory_space<vmem>>, vector<2x128xf32>
    tpu.vector_store %arg14[%c0_101, %c0_102], %139 {strides = array<i32>} : memref<2x128xf32, #tpu.memory_space<vmem>>, vector<2x128xf32>,
    return
  }
}

</mosaic_0001>

<bundles_post_ra>
// kernel: tpu_custom_call.1
= control target key start
LH: loop header
LB: loop body
LE: loop exit
PB: predicated region body
PF: predicated region fallthrough
CT: control target
= control target key end

     0   :  { %s3113_s0 = inlined_call_operand.hbm [shape: f32[3], index: 0, kind: input, shape index: {}]   ;;  %s3114_s1 = inlined_call_operand.hbm [shape: f32[16,128], index: 1, kind: input, shape index: {}]   ;;  %s3115_s2 = inlined_call_operand.hbm [shape: bf16[32,8], index: 2, kind: input, shape index: {}]   ;;  %s3116_s3 = inlined_call_operand.hbm [shape: bf16[32,16], index: 3, kind: input, shape index: {}]   ;;  %s3117_s4 = inlined_call_operand.hbm [shape: bf16[16,32], index: 4, kind: input, shape index: {}]   ;;  %s3118_s5 = inlined_call_operand.hbm [shape: bf16[2,16], index: 5, kind: input, shape index: {}]   ;;  %s3119_s6 = inlined_call_operand.hbm [shape: bf16[3,8,128], index: 6, kind: input, shape index: {}]   ;;  %s3120_s7 = inlined_call_operand.hbm [shape: f32[3,1,128], index: 7, kind: input, shape index: {}]   ;;  %s3121_s8 = inlined_call_operand.hbm [shape: bf16[3,128,128], index: 8, kind: input, shape index: {}]   ;;  %s3122_s9 = inlined_call_operand.hbm [shape: f32[3,1,128], index: 9, kind: input, shape index: {}]   ;;  %s3123_s10 = inlined_call_operand.hbm [shape: bf16[3,128,128], index: 10, kind: input, shape index: {}]   ;;  %s3124_s11 = inlined_call_operand.hbm [shape: f32[3,1,128], index: 11, kind: input, shape index: {}]   ;;  %s3125_s12 = inlined_call_operand.hbm [shape: bf16[128,128], index: 12, kind: input, shape index: {}]   ;;  %s3126_s13 = inlined_call_operand.hbm [shape: f32[1,128], index: 13, kind: input, shape index: {}]   ;;  %s3127_s14 = inlined_call_operand.hbm [shape: f32[2,128], index: 14, kind: output, shape index: {0}]   ;;  %s3128_s15 = inlined_call_operand.hbm [shape: f32[2,128], index: 15, kind: output, shape index: {1}]   ;;  %s3129_s16 = inlined_call_operand.hbm [shape: f32[16,128], index: 16, kind: output, shape index: {2}]  }
   0x1   :  { %3132 = sst [smem:[#allocation39_spill]] %s3113_s0 }
   0x2   :  { %3133 = sst [smem:[#allocation40_spill]] %s3127_s14 }
   0x3   :  { %22 = vsyncpa [#allocation5], 0 }
   0x4   :  { %23 = vsyncpa [#allocation3], 0 }
   0x5   :  { %24 = vsyncpa [#allocation8], 0 }
   0x6   :  { %25 = vsyncpa [#allocation11], 0 }
   0x7   :  { %26 = vsyncpa [#allocation14], 0 }
   0x8   :  { %27 = vsyncpa [#allocation17], 0 }
   0x9   :  { %28 = vsyncpa [#allocation20], 0 }
   0xa   :  { %29 = vsyncpa [#allocation23], 0 }
   0xb   :  { %30 = vsyncpa [#allocation4], 0 }
   0xc   :  { %31 = vsyncpa [#allocation27], 0  ;;  %s2595_s21 = smov [#allocation7]   ;;  %s2213_s25 = scalar_lea.hbm %s3115_s2, 256 }
   0xd   :  { %s57_s22 = sshll.u32 %s2595_s21, 4  ;;  %p2214_p0 = scmp.ne.s32.totalorder %s3115_s2, %s2213_s25  ;;  %s58_s22 = int_to_ptr.vmem [resolvable:$true] %s57_s22 }
   0xe   :  { %p2217_p1 = scmp.lt.u32.totalorder %s2213_s25, %s3115_s2 }
  0x10   :  { %p2219_p2 = pnand %p2217_p1, %p2214_p0 }
  0x12   :  { %2222 = shalt.err (!%p2219_p2)
}
  0x13   :  { %s2223_s30 = scalar_lea.vmem %s58_s22, 256  ;;  %p2228_p4 = scmp.lt.s32.totalorder %s58_s22, %s58_s22 }
  0x14   :  { %p2224_p3 = scmp.ne.s32.totalorder %s58_s22, %s2223_s30  ;;  %p2229_p5 = scmp.lt.s32.totalorder %s2223_s30, %s2223_s30 }
  0x16   :  { %p2230_p6 = por %p2229_p5, %p2228_p4 }
  0x18   :  { %p2231_p7 = pnand %p2230_p6, %p2224_p3 }
  0x1a   :  { %2234 = shalt.err (!%p2231_p7)
}
  0x1b   :  { %s2596_s0 = smov 64   ;;  %s2597_s17 = smov 4  }
  0x1c   :  { %63 = dma.hbm_to_vmem [thread:$0]  %s3115_s2, 256, %s58_s22, [#allocation8], %s2596_s0, %s2596_s0, %s2597_s17  }
  0x1d   :  { %s2598_s20 = smov [#allocation10]   ;;  %s2599_s23 = smov [#allocation13]  }
  0x1e   :  { %s81_s21 = sshll.u32 %s2598_s20, 4  ;;  %s103_s24 = sshll.u32 %s2599_s23, 4  ;;  %s82_s21 = int_to_ptr.vmem [resolvable:$true] %s81_s21  ;;  %s104_s24 = int_to_ptr.vmem [resolvable:$true] %s103_s24 }
  0x1f   :  { %s2235_s27 = scalar_lea.hbm %s3117_s4, 128 }
  0x20   :  { %p2236_p8 = scmp.ne.s32.totalorder %s3117_s4, %s2235_s27  ;;  %p2239_p9 = scmp.lt.u32.totalorder %s2235_s27, %s3117_s4 }
  0x22   :  { %p2241_p10 = pnand %p2239_p9, %p2236_p8 }
  0x24   :  { %2244 = shalt.err (!%p2241_p10)
}
  0x25   :  { %s2245_s2 = scalar_lea.vmem %s82_s21, 128  ;;  %p2250_p12 = scmp.lt.s32.totalorder %s82_s21, %s82_s21 }
  0x26   :  { %p2246_p11 = scmp.ne.s32.totalorder %s82_s21, %s2245_s2  ;;  %p2251_p13 = scmp.lt.s32.totalorder %s2245_s2, %s2245_s2 }
  0x28   :  { %p2252_p0 = por %p2251_p13, %p2250_p12 }
  0x2a   :  { %p2253_p1 = pnand %p2252_p0, %p2246_p11 }
  0x2c   :  { %2256 = shalt.err (!%p2253_p1)
}
  0x2d   :  { %87 = dma.hbm_to_vmem [thread:$0]  %s3117_s4, 128, %s82_s21, [#allocation11], %s2596_s0, %s2596_s0, %s2597_s17  }
  0x2e   :  { %s2257_s20 = scalar_lea.hbm %s3119_s6, 192 }
  0x2f   :  { %p2258_p2 = scmp.ne.s32.totalorder %s3119_s6, %s2257_s20  ;;  %p2261_p3 = scmp.lt.u32.totalorder %s2257_s20, %s3119_s6 }
  0x31   :  { %p2263_p4 = pnand %p2261_p3, %p2258_p2 }
  0x33   :  { %2266 = shalt.err (!%p2263_p4)
}
  0x34   :  { %s2267_s28 = scalar_lea.vmem %s104_s24, 192  ;;  %p2272_p6 = scmp.lt.s32.totalorder %s104_s24, %s104_s24 }
  0x35   :  { %p2268_p5 = scmp.ne.s32.totalorder %s104_s24, %s2267_s28  ;;  %p2273_p7 = scmp.lt.s32.totalorder %s2267_s28, %s2267_s28 }
  0x37   :  { %p2274_p8 = por %p2273_p7, %p2272_p6 }
  0x39   :  { %p2275_p9 = pnand %p2274_p8, %p2268_p5 }
  0x3b   :  { %2278 = shalt.err (!%p2275_p9)
}
  0x3c   :  { %109 = dma.hbm_to_vmem [thread:$0]  %s3119_s6, 192, %s104_s24, [#allocation14], %s2596_s0, %s2596_s0, %s2597_s17  }
  0x3d   :  { %s2600_s29 = smov [#allocation16]   ;;  %s2601_s2 = smov [#allocation19]  }
  0x3e   :  { %s127_s30 = sshll.u32 %s2600_s29, 4  ;;  %s151_s22 = sshll.u32 %s2601_s2, 4  ;;  %s128_s30 = int_to_ptr.vmem [resolvable:$true] %s127_s30  ;;  %s152_s22 = int_to_ptr.vmem [resolvable:$true] %s151_s22 }
  0x3f   :  { %s2279_s14 = scalar_lea.hbm %s3121_s8, 3072 }
  0x40   :  { %p2280_p10 = scmp.ne.s32.totalorder %s3121_s8, %s2279_s14  ;;  %p2283_p11 = scmp.lt.u32.totalorder %s2279_s14, %s3121_s8 }
  0x42   :  { %p2285_p12 = pnand %p2283_p11, %p2280_p10 }
  0x44   :  { %2288 = shalt.err (!%p2285_p12)
}
  0x45   :  { %s2289_s6 = scalar_lea.vmem %s128_s30, 3072  ;;  %p2294_p0 = scmp.lt.s32.totalorder %s128_s30, %s128_s30 }
  0x46   :  { %p2290_p13 = scmp.ne.s32.totalorder %s128_s30, %s2289_s6  ;;  %p2295_p1 = scmp.lt.s32.totalorder %s2289_s6, %s2289_s6 }
  0x48   :  { %p2296_p2 = por %p2295_p1, %p2294_p0 }
  0x4a   :  { %p2297_p3 = pnand %p2296_p2, %p2290_p13 }
  0x4c   :  { %2300 = shalt.err (!%p2297_p3)
}
  0x4d   :  { %133 = dma.hbm_to_vmem [thread:$0]  %s3121_s8, 3072, %s128_s30, [#allocation17], %s2596_s0, %s2596_s0, %s2597_s17  }
  0x4e   :  { %s2301_s21 = scalar_lea.hbm %s3123_s10, 3072 }
  0x4f   :  { %p2302_p4 = scmp.ne.s32.totalorder %s3123_s10, %s2301_s21  ;;  %p2305_p5 = scmp.lt.u32.totalorder %s2301_s21, %s3123_s10 }
  0x51   :  { %p2307_p6 = pnand %p2305_p5, %p2302_p4 }
  0x53   :  { %2310 = shalt.err (!%p2307_p6)
}
  0x54   :  { %s2311_s14 = scalar_lea.vmem %s152_s22, 3072  ;;  %p2316_p8 = scmp.lt.s32.totalorder %s152_s22, %s152_s22 }
  0x55   :  { %p2312_p7 = scmp.ne.s32.totalorder %s152_s22, %s2311_s14  ;;  %p2317_p9 = scmp.lt.s32.totalorder %s2311_s14, %s2311_s14 }
  0x57   :  { %p2318_p10 = por %p2317_p9, %p2316_p8 }
  0x59   :  { %p2319_p11 = pnand %p2318_p10, %p2312_p7 }
  0x5b   :  { %2322 = shalt.err (!%p2319_p11)
}
  0x5c   :  { %157 = dma.hbm_to_vmem [thread:$0]  %s3123_s10, 3072, %s152_s22, [#allocation20], %s2596_s0, %s2596_s0, %s2597_s17  }
  0x5d   :  { %s2602_s20 = smov [#allocation22]   ;;  %s2323_s6 = scalar_lea.hbm %s3125_s12, 1024 }
  0x5e   :  { %s175_s23 = sshll.u32 %s2602_s20, 4  ;;  %p2324_p12 = scmp.ne.s32.totalorder %s3125_s12, %s2323_s6  ;;  %s176_s23 = int_to_ptr.vmem [resolvable:$true] %s175_s23 }
  0x5f   :  { %p2327_p13 = scmp.lt.u32.totalorder %s2323_s6, %s3125_s12 }
  0x61   :  { %p2329_p0 = pnand %p2327_p13, %p2324_p12 }
  0x63   :  { %2332 = shalt.err (!%p2329_p0)
}
  0x64   :  { %s2333_s21 = scalar_lea.vmem %s176_s23, 1024  ;;  %p2338_p2 = scmp.lt.s32.totalorder %s176_s23, %s176_s23 }
  0x65   :  { %p2334_p1 = scmp.ne.s32.totalorder %s176_s23, %s2333_s21  ;;  %p2339_p3 = scmp.lt.s32.totalorder %s2333_s21, %s2333_s21 }
  0x67   :  { %p2340_p4 = por %p2339_p3, %p2338_p2 }
  0x69   :  { %p2341_p5 = pnand %p2340_p4, %p2334_p1 }
  0x6b   :  { %2344 = shalt.err (!%p2341_p5)
}
  0x6c   :  { %181 = dma.hbm_to_vmem [thread:$0]  %s3125_s12, 1024, %s176_s23, [#allocation23], %s2596_s0, %s2596_s0, %s2597_s17  }
  0x6d   :  { %s3134_s18 = sld [smem:[#allocation39_spill]] }
  0x73   :  { %s2345_s19 = scalar_lea.hbm %s3134_s18, 16 }
  0x74   :  { %p2346_p6 = scmp.ne.s32.totalorder %s3134_s18, %s2345_s19  ;;  %p2349_p7 = scmp.lt.u32.totalorder %s2345_s19, %s3134_s18 }
  0x76   :  { %p2351_p8 = pnand %p2349_p7, %p2346_p6 }
  0x78   :  { %2354 = shalt.err (!%p2351_p8)
}
  0x79   :  { %s2603_s25 = smov [#allocation2]   ;;  %s2604_s12 = smov [#allocation6]  }
  0x7a   :  { %39 = dma.hbm_to_smem %s3134_s18, 16, %s2603_s25, [#allocation5]  }
  0x7b   :  { %s45_s23 = sshll.u32 %s2604_s12, 4  ;;  %s2355_s28 = scalar_lea.hbm %s3114_s1, 256  ;;  %s46_s23 = int_to_ptr.vmem [resolvable:$true] %s45_s23 }
  0x7c   :  { %p2356_p9 = scmp.ne.s32.totalorder %s3114_s1, %s2355_s28  ;;  %p2359_p10 = scmp.lt.u32.totalorder %s2355_s28, %s3114_s1 }
  0x7e   :  { %p2361_p11 = pnand %p2359_p10, %p2356_p9 }
  0x80   :  { %2364 = shalt.err (!%p2361_p11)
}
  0x81   :  { %s2365_s29 = scalar_lea.vmem %s46_s23, 256  ;;  %p2370_p13 = scmp.lt.s32.totalorder %s46_s23, %s46_s23 }
  0x82   :  { %p2366_p12 = scmp.ne.s32.totalorder %s46_s23, %s2365_s29  ;;  %p2371_p0 = scmp.lt.s32.totalorder %s2365_s29, %s2365_s29 }
  0x84   :  { %p2372_p1 = por %p2371_p0, %p2370_p13 }
  0x86   :  { %p2373_p2 = pnand %p2372_p1, %p2366_p12 }
  0x88   :  { %2376 = shalt.err (!%p2373_p2)
}
  0x89   :  { %s2605_s2 = smov 128   ;;  %s2606_s18 = smov 8  }
  0x8a   :  { %51 = dma.hbm_to_vmem [thread:$0]  %s3114_s1, 256, %s46_s23, [#allocation3], %s2605_s2, %s2605_s2, %s2606_s18  }
  0x8b   :  { %s2607_s8 = smov [#allocation9]   ;;  %s2608_s20 = smov [#allocation12]  }
  0x8c   :  { %s69_s30 = sshll.u32 %s2607_s8, 4  ;;  %s94_s25 = sshll.u32 %s2608_s20, 4  ;;  %s70_s30 = int_to_ptr.vmem [resolvable:$true] %s69_s30  ;;  %s95_s25 = int_to_ptr.vmem [resolvable:$true] %s94_s25 }
  0x8d   :  { %s2377_s12 = scalar_lea.hbm %s3116_s3, 256 }
  0x8e   :  { %p2378_p3 = scmp.ne.s32.totalorder %s3116_s3, %s2377_s12  ;;  %p2381_p4 = scmp.lt.u32.totalorder %s2377_s12, %s3116_s3 }
  0x90   :  { %p2383_p5 = pnand %p2381_p4, %p2378_p3 }
  0x92   :  { %2386 = shalt.err (!%p2383_p5)
}
  0x93   :  { %s2387_s1 = scalar_lea.vmem %s70_s30, 256  ;;  %p2392_p7 = scmp.lt.s32.totalorder %s70_s30, %s70_s30 }
  0x94   :  { %p2388_p6 = scmp.ne.s32.totalorder %s70_s30, %s2387_s1  ;;  %p2393_p8 = scmp.lt.s32.totalorder %s2387_s1, %s2387_s1 }
  0x96   :  { %p2394_p9 = por %p2393_p8, %p2392_p7 }
  0x98   :  { %p2395_p10 = pnand %p2394_p9, %p2388_p6 }
  0x9a   :  { %2398 = shalt.err (!%p2395_p10)
}
  0x9b   :  { %75 = dma.hbm_to_vmem [thread:$0]  %s3116_s3, 256, %s70_s30, [#allocation8], %s2596_s0, %s2596_s0, %s2597_s17  }
  0x9c   :  { %s2399_s29 = scalar_lea.hbm %s3118_s5, 16 }
  0x9d   :  { %p2400_p11 = scmp.ne.s32.totalorder %s3118_s5, %s2399_s29  ;;  %p2403_p12 = scmp.lt.u32.totalorder %s2399_s29, %s3118_s5 }
  0x9f   :  { %p2405_p13 = pnand %p2403_p12, %p2400_p11 }
  0xa1   :  { %2408 = shalt.err (!%p2405_p13)
}
  0xa2   :  { %s2409_s26 = scalar_lea.vmem %s95_s25, 16  ;;  %s2413_s6 = scalar_lea.vmem %s95_s25, 32 }
  0xa3   :  { %p2410_p0 = scmp.ne.s32.totalorder %s95_s25, %s2409_s26  ;;  %p2414_p1 = scmp.lt.s32.totalorder %s95_s25, %s95_s25 }
  0xa4   :  { %p2415_p2 = scmp.lt.s32.totalorder %s2413_s6, %s2409_s26 }
  0xa6   :  { %p2416_p3 = por %p2415_p2, %p2414_p1 }
  0xa8   :  { %p2417_p4 = pnand %p2416_p3, %p2410_p0 }
  0xaa   :  { %2420 = shalt.err (!%p2417_p4)
}
  0xab   :  { %97 = dma.hbm_to_vmem [thread:$0]  %s3118_s5, 16, %s95_s25, [#allocation11]  }
  0xac   :  { %s2609_s17 = smov [#allocation15]   ;;  %s2421_s27 = scalar_lea.hbm %s3120_s7, 48 }
  0xad   :  { %s115_s30 = sshll.u32 %s2609_s17, 4  ;;  %p2422_p5 = scmp.ne.s32.totalorder %s3120_s7, %s2421_s27  ;;  %s116_s30 = int_to_ptr.vmem [resolvable:$true] %s115_s30 }
  0xae   :  { %p2425_p6 = scmp.lt.u32.totalorder %s2421_s27, %s3120_s7 }
  0xb0   :  { %p2427_p7 = pnand %p2425_p6, %p2422_p5 }
  0xb2   :  { %2430 = shalt.err (!%p2427_p7)
}
  0xb3   :  { %s2431_s21 = scalar_lea.vmem %s116_s30, 48  ;;  %s2435_s5 = scalar_lea.vmem %s116_s30, 64 }
  0xb4   :  { %p2432_p8 = scmp.ne.s32.totalorder %s116_s30, %s2431_s21  ;;  %p2436_p9 = scmp.lt.s32.totalorder %s116_s30, %s116_s30 }
  0xb5   :  { %p2437_p10 = scmp.lt.s32.totalorder %s2435_s5, %s2431_s21 }
  0xb7   :  { %p2438_p11 = por %p2437_p10, %p2436_p9 }
  0xb9   :  { %p2439_p12 = pnand %p2438_p11, %p2432_p8 }
  0xbb   :  { %2442 = shalt.err (!%p2439_p12)
}
  0xbc   :  { %s2610_s25 = smov 16   ;;  %s2611_s10 = smov 1  }
  0xbd   :  { %121 = dma.hbm_to_vmem [thread:$0]  %s3120_s7, 48, %s116_s30, [#allocation14], %s2610_s25, %s2610_s25, %s2611_s10  }
  0xbe   :  { %s2612_s19 = smov [#allocation18]   ;;  %s2613_s8 = smov [#allocation21]  }
  0xbf   :  { %s139_s14 = sshll.u32 %s2612_s19, 4  ;;  %s163_s20 = sshll.u32 %s2613_s8, 4  ;;  %s140_s14 = int_to_ptr.vmem [resolvable:$true] %s139_s14  ;;  %s164_s20 = int_to_ptr.vmem [resolvable:$true] %s163_s20 }
  0xc0   :  { %s2443_s3 = scalar_lea.hbm %s3122_s9, 48 }
  0xc1   :  { %p2444_p13 = scmp.ne.s32.totalorder %s3122_s9, %s2443_s3  ;;  %p2447_p0 = scmp.lt.u32.totalorder %s2443_s3, %s3122_s9 }
  0xc3   :  { %p2449_p1 = pnand %p2447_p0, %p2444_p13 }
  0xc5   :  { %2452 = shalt.err (!%p2449_p1)
}
  0xc6   :  { %s2453_s7 = scalar_lea.vmem %s140_s14, 48  ;;  %s2457_s30 = scalar_lea.vmem %s140_s14, 64 }
  0xc7   :  { %p2454_p2 = scmp.ne.s32.totalorder %s140_s14, %s2453_s7  ;;  %p2458_p3 = scmp.lt.s32.totalorder %s140_s14, %s140_s14 }
  0xc8   :  { %p2459_p4 = scmp.lt.s32.totalorder %s2457_s30, %s2453_s7 }
  0xca   :  { %p2460_p5 = por %p2459_p4, %p2458_p3 }
  0xcc   :  { %p2461_p6 = pnand %p2460_p5, %p2454_p2 }
  0xce   :  { %2464 = shalt.err (!%p2461_p6)
}
  0xcf   :  { %145 = dma.hbm_to_vmem [thread:$0]  %s3122_s9, 48, %s140_s14, [#allocation17], %s2610_s25, %s2610_s25, %s2611_s10  }
  0xd0   :  { %s2465_s23 = scalar_lea.hbm %s3124_s11, 48 }
  0xd1   :  { %p2466_p7 = scmp.ne.s32.totalorder %s3124_s11, %s2465_s23  ;;  %p2469_p8 = scmp.lt.u32.totalorder %s2465_s23, %s3124_s11 }
  0xd3   :  { %p2471_p9 = pnand %p2469_p8, %p2466_p7 }
  0xd5   :  { %2474 = shalt.err (!%p2471_p9)
}
  0xd6   :  { %s2475_s19 = scalar_lea.vmem %s164_s20, 48  ;;  %s2479_s8 = scalar_lea.vmem %s164_s20, 64 }
  0xd7   :  { %p2476_p10 = scmp.ne.s32.totalorder %s164_s20, %s2475_s19  ;;  %p2480_p11 = scmp.lt.s32.totalorder %s164_s20, %s164_s20 }
  0xd8   :  { %p2481_p12 = scmp.lt.s32.totalorder %s2479_s8, %s2475_s19 }
  0xda   :  { %p2482_p13 = por %p2481_p12, %p2480_p11 }
  0xdc   :  { %p2483_p0 = pnand %p2482_p13, %p2476_p10 }
  0xde   :  { %2486 = shalt.err (!%p2483_p0)
}
  0xdf   :  { %169 = dma.hbm_to_vmem [thread:$0]  %s3124_s11, 48, %s164_s20, [#allocation20], %s2610_s25, %s2610_s25, %s2611_s10  }
  0xe0   :  { %s2614_s26 = smov [#allocation24]   ;;  %s2487_s17 = scalar_lea.hbm %s3126_s13, 16 }
  0xe1   :  { %s188_s6 = sshll.u32 %s2614_s26, 4  ;;  %p2488_p1 = scmp.ne.s32.totalorder %s3126_s13, %s2487_s17  ;;  %s189_s6 = int_to_ptr.vmem [resolvable:$true] %s188_s6 }
  0xe2   :  { %p2491_p2 = scmp.lt.u32.totalorder %s2487_s17, %s3126_s13 }
  0xe4   :  { %p2493_p3 = pnand %p2491_p2, %p2488_p1 }
  0xe6   :  { %2496 = shalt.err (!%p2493_p3)
}
  0xe7   :  { %s2497_s27 = scalar_lea.vmem %s189_s6, 16  ;;  %s2501_s11 = scalar_lea.vmem %s189_s6, 32 }
  0xe8   :  { %p2498_p4 = scmp.ne.s32.totalorder %s189_s6, %s2497_s27  ;;  %p2502_p5 = scmp.lt.s32.totalorder %s189_s6, %s189_s6 }
  0xe9   :  { %p2503_p6 = scmp.lt.s32.totalorder %s2501_s11, %s2497_s27 }
  0xeb   :  { %p2504_p7 = por %p2503_p6, %p2502_p5 }
  0xed   :  { %p2505_p8 = pnand %p2504_p7, %p2498_p4 }
  0xef   :  { %2508 = shalt.err (!%p2505_p8)
}
  0xf0   :  { %191 = dma.hbm_to_vmem [thread:$0]  %s3126_s13, 16, %s189_s6, [#allocation23]  }
  0xf1   :  { %2575 = dma.done.wait [#allocation5], 16  }
  0xf2   :  { %2576 = vsyncadd [#allocation5], 4294967280 }
  0xf3   :  { %2577 = dma.done.wait [#allocation3], 256  }
  0xf4   :  { %2578 = vsyncadd [#allocation3], 4294967040 }
  0xf5   :  { %2579 = dma.done.wait [#allocation8], 512  }
  0xf6   :  { %2580 = vsyncadd [#allocation8], 4294966784 }
  0xf7   :  { %2581 = dma.done.wait [#allocation11], 144  }
  0xf8   :  { %2582 = vsyncadd [#allocation11], 4294967152 }
  0xf9   :  { %2583 = dma.done.wait [#allocation14], 240  }
  0xfa   :  { %2584 = vsyncadd [#allocation14], 4294967056 }
  0xfb   :  { %2585 = dma.done.wait [#allocation17], 3120  }
  0xfc   :  { %2586 = vsyncadd [#allocation17], 4294964176 }
  0xfd   :  { %2587 = dma.done.wait [#allocation20], 3120  }
  0xfe   :  { %2588 = vsyncadd [#allocation20], 4294964176 }
  0xff   :  { %2589 = dma.done.wait [#allocation23], 1040  }
 0x100   :  { %2590 = vsyncadd [#allocation23], 4294966256 }
 0x101   :  { %234 = sfence }
 0x102   :  { %v248_v0 = vld [vmem:[#allocation13] sm:$0xf]  ;;  %vm273_vm0 = vcmask 1043456   ;;  %v2906_v1 = vld [vmem:[#allocation6] sm:$0xff]  ;;  %v2908_v2 = vld [vmem:[#allocation6 + $0x8] sm:$0xff]  ;;  %vm266_vm1 = vcmask 64512  }
 0x103   :  { %2120 = vmatprep.subr.msk.bf16.mxu1 %vm273_vm0, %v248_v0  ;;  %v275_v3 = vsel %vm273_vm0, %v248_v0, 0  ;;  %v326_v4 = vpack.c.bf16 %v2908_v2, %v2906_v1  ;;  %v2914_v5 = vld [vmem:[#allocation7] sm:$0xff]   ;;  %v2916_v6 = vld [vmem:[#allocation7 + $0x8] sm:$0xff]   ;;  %vm337_vm2 = vcmask 130048   ;;  %v2920_v7 = vld [vmem:[#allocation9] sm:$0xff]   ;;  %v2615_v9 = vmov 0.0  }
 0x104   :  { %1891 = vmatpush3.bf16.msra.mxu1 %v275_v3  ;;  %1892 = vmatprep.mubr.msk.bf16.mxu1 %vm266_vm1, %v2914_v5  ;;  %v2922_v8 = vld [vmem:[#allocation9 + $0x8] sm:$0xff]   ;;  %vm2616_vm3 = vmmov 0   ;;  %v1709_v10 = vld [vmem:[#allocation15] ss:$0 sm:$0xff]  ;;  %v2937_v33 = vld [vmem:[#allocation10] sm:$0xff]   ;;  %vm404_vm4 = vcmask 261120  }
 0x105   :  { %1896 = vmatprep.subr.bf16.mxu0 %v326_v4  ;;  %1898 = vmatprep.mubr.msk.bf16.mxu0 %vm337_vm2, %v2920_v7  ;;  %v2153_v34 = vld [vmem:[#allocation16] sm:$0xff]   ;;  %v2154_v35 = vld [vmem:[#allocation16 + $0x8] sm:$0xff]   ;;  %v2155_v36 = vld [vmem:[#allocation16 + $0x10] sm:$0xff]   ;;  %s449_s13 = sld [smem:[#allocation2]]  ;;  %s1744_s28 = sld [smem:[#allocation2 + $0x1]]  ;;  %vm1644_vm5 = vcmask 1041408  }
 0x106   :  { %1897 = vmatpush3.bf16.msra.mxu0 %v326_v4  ;;  %1902 = vmatprep.subr.bf16.mxu1 %v2615_v9  ;;  %v2156_v37 = vld [vmem:[#allocation16 + $0x18] sm:$0xff]   ;;  %v2157_v38 = vld [vmem:[#allocation16 + $0x20] sm:$0xff]   ;;  %v2158_v39 = vld [vmem:[#allocation16 + $0x28] sm:$0xff]   ;;  %s1769_s1 = sld [smem:[#allocation2 + $0x2]]  ;;  %s2617_s21 = smov [#allocation26]  }
 0x107   :  { %1893 = vmatmul.mubr.msk.bf16.vlgmr.msra.gmra.mrb[0].mxu1 %vm266_vm1, %v2916_v6  ;;  %1930 = vmatprep.subr.bf16.mxu0 %v2615_v9  ;;  %v2159_v40 = vld [vmem:[#allocation16 + $0x30] sm:$0xff]   ;;  %v2160_v41 = vld [vmem:[#allocation16 + $0x38] sm:$0xff]   ;;  %v2161_v42 = vld [vmem:[#allocation19] sm:$0xff]   ;;  %s1674_s5 = sshll.u32 %s2617_s21, 4  ;;  %s1675_s5 = int_to_ptr.vmem [resolvable:$true] %s1674_s5 }
 0x108   :  { %1906 = vmatprep.mubr.msk.bf16.mxu1 %vm2616_vm3, %v2615_v9  ;;  %v2162_v43 = vld [vmem:[#allocation19 + $0x8] sm:$0xff]   ;;  %v2163_v44 = vld [vmem:[#allocation19 + $0x10] sm:$0xff]   ;;  %v2164_v45 = vld [vmem:[#allocation19 + $0x18] sm:$0xff]   ;;  %s2509_s22 = scalar_lea.vmem %s1675_s5, 32  ;;  %p2514_p10 = scmp.lt.s32.totalorder %s1675_s5, %s1675_s5 }
 0x109   :  { %1899 = vmatmul.mubr.msk.bf16.vlgmr.msra.gmra.mrb[0].mxu0 %vm337_vm2, %v2922_v8  ;;  %v2165_v46 = vld [vmem:[#allocation19 + $0x20] sm:$0xff]   ;;  %v2166_v47 = vld [vmem:[#allocation19 + $0x28] sm:$0xff]   ;;  %v2167_v58 = vld [vmem:[#allocation19 + $0x30] sm:$0xff]   ;;  %p2510_p9 = scmp.ne.s32.totalorder %s1675_s5, %s2509_s22  ;;  %p2515_p11 = scmp.lt.s32.totalorder %s2509_s22, %s2509_s22 }
 0x10a   :  { %1946 = vmatprep.mubr.msk.bf16.mxu0 %vm2616_vm3, %v2615_v9  ;;  %1931 = vmatpush3.bf16.msra.mxu0 %v2161_v42  ;;  %v2168_v59 = vld [vmem:[#allocation19 + $0x38] sm:$0xff]   ;;  %v687_v60 = vld [vmem:[#allocation13 + $0x4] sm:$0xf] }
 0x10b   :  { %1932 = vmatprep.subr.bf16.mxu0 %v2615_v9  ;;  %s450_s20 = sadd.f32 1.0, %s449_s13  ;;  %v697_v61 = vsel %vm273_vm0, %v687_v60, 0  ;;  %v1720_v62 = vld [vmem:[#allocation18] ss:$0 sm:$0xff]  ;;  %p2516_p12 = por %p2515_p11, %p2514_p10 }
 0x10c   :  { %s846_s4 = sadd.f32 1.0, %s1744_s28 }
 0x10d   :  { %v451_v48 = vstv %s450_s20  ;;  %s1246_s23 = sadd.f32 1.0, %s1769_s1  ;;  %p2517_p13 = pnand %p2516_p12, %p2510_p9 }
 0x10e   :  { %1933 = vmatpush3.bf16.msra.mxu0 %v2162_v43  ;;  %v452_v49 = vmul.f32 %v451_v48, %v2906_v1  ;;  %v453_v50 = vmul.f32 %v451_v48, %v2908_v2  ;;  %v2178_v48 = vld [vmem:[#allocation19 + $0x48] sm:$0xff]  }
 0x10f   :  { %1934 = vmatprep.subr.bf16.mxu0 %v2615_v9 }
 0x112   :  { %1935 = vmatpush3.bf16.msra.mxu0 %v2163_v44 }
 0x113   :  { %1936 = vmatprep.subr.bf16.mxu0 %v2615_v9 }
 0x116   :  { %1937 = vmatpush3.bf16.msra.mxu0 %v2164_v45  ;;  %v2175_v45 = vld [vmem:[#allocation16 + $0x70] sm:$0xff]  }
 0x117   :  { %1938 = vmatprep.subr.bf16.mxu0 %v2615_v9 }
 0x11a   :  { %1939 = vmatpush3.bf16.msra.mxu0 %v2165_v46  ;;  %v2176_v46 = vld [vmem:[#allocation16 + $0x78] sm:$0xff]  }
 0x11b   :  { %1940 = vmatprep.subr.bf16.mxu0 %v2615_v9 }
 0x11e   :  { %1941 = vmatpush3.bf16.msra.mxu0 %v2166_v47  ;;  %v2177_v47 = vld [vmem:[#allocation19 + $0x40] sm:$0xff]  }
 0x11f   :  { %1942 = vmatprep.subr.bf16.mxu0 %v2615_v9 }
 0x122   :  { %1943 = vmatpush3.bf16.msra.mxu0 %v2167_v58 }
 0x123   :  { %1944 = vmatprep.subr.bf16.mxu0 %v2615_v9 }
 0x126   :  { %1945 = vmatpush3.bf16.msra.mxu0 %v2168_v59 }
 0x127   :  { %1970 = vmatprep.subr.bf16.mxu0 %v2615_v9 }
 0x1da   :  { %v1894_v11 = vpop.f32.mrb[0].mxu1 }
 0x1db   :  { %v320_v12 = vadd.f32 %v1894_v11, %v1709_v10  ;;  %v311_v13 = vpop.f32.mrb[1].mxu1 }
 0x1dc   :  { %v312_v14 = vadd.f32 %v1709_v10, %v311_v13  ;;  %v1895_v15 = vpop.f32.mrb[2].mxu1  ;;  %v1900_v16 = vpop.f32.mrb[0].mxu0  ;;  %v1729_v13 = vld [vmem:[#allocation21] ss:$0 sm:$0xff] }
 0x1dd   :  { %v323_v17 = vadd.f32 %v1895_v15, %v1709_v10  ;;  %v387_v18 = vadd.f32 %v1900_v16, %v320_v12  ;;  %v314_v19 = vpop.f32.mrb[3].mxu1  ;;  %v378_v20 = vpop.f32.mrb[1].mxu0 }
 0x1de   :  { %v315_v21 = vadd.f32 %v1709_v10, %v314_v19  ;;  %v379_v22 = vadd.f32 %v378_v20, %v312_v14  ;;  %v1901_v23 = vpop.f32.mrb[2].mxu0 }
 0x1df   :  { %v390_v24 = vadd.f32 %v1901_v23, %v323_v17  ;;  %v381_v25 = vpop.f32.mrb[3].mxu0  ;;  %v395_v27 = vmax.f32 %v387_v18, 0.0  ;;  %v2169_v23 = vld [vmem:[#allocation16 + $0x40] sm:$0xff]  }
 0x1e0   :  { %v382_v26 = vadd.f32 %v381_v25, %v315_v21  ;;  %v393_v29 = vmax.f32 %v379_v22, 0.0  ;;  %v2171_v25 = vld [vmem:[#allocation16 + $0x50] sm:$0xff]  }
 0x1e1   :  { %v396_v28 = vmax.f32 %v390_v24, 0.0  ;;  %v2170_v24 = vld [vmem:[#allocation16 + $0x48] sm:$0xff]  }
 0x1e2   :  { %v394_v30 = vmax.f32 %v382_v26, 0.0  ;;  %v2172_v26 = vld [vmem:[#allocation16 + $0x58] sm:$0xff]  }
 0x1e3   :  { %v398_v31 = vpack.c.bf16 %v396_v28, %v395_v27  ;;  %v2173_v27 = vld [vmem:[#allocation16 + $0x60] sm:$0xff]   ;;  %v2174_v28 = vld [vmem:[#allocation16 + $0x68] sm:$0xff]  }
 0x1e4   :  { %v397_v32 = vpack.c.bf16 %v394_v30, %v393_v29  ;;  %v1738_v29 = vld [vmem:[#allocation15 + $0x1] ss:$0 sm:$0xff] }
 0x1e6   :  { %1903 = vmatpush3.bf16.msra.mxu1 %v397_v32 }
 0x1e7   :  { %1904 = vmatprep.subr.bf16.mxu1 %v2615_v9 }
 0x1ea   :  { %1905 = vmatpush3.bf16.msra.mxu1 %v398_v31 }
 0x1eb   :  { %1910 = vmatprep.subr.bf16.mxu1 %v2615_v9 }
 0x1ed   :  { %1907 = vmatmul.mubr.msk.bf16.vlgmr.msra.gmra.mrb[4].mxu1 %vm404_vm4, %v2937_v33 }
 0x1ee   :  { %1911 = vmatpush3.bf16.msra.mxu1 %v2153_v34  ;;  %1926 = vmatprep.mubr.msk.bf16.mxu1 %vm2616_vm3, %v2615_v9 }
 0x1ef   :  { %1912 = vmatprep.subr.bf16.mxu1 %v2615_v9 }
 0x1f2   :  { %1913 = vmatpush3.bf16.msra.mxu1 %v2154_v35 }
 0x1f3   :  { %1914 = vmatprep.subr.bf16.mxu1 %v2615_v9 }
 0x1f6   :  { %1915 = vmatpush3.bf16.msra.mxu1 %v2155_v36 }
 0x1f7   :  { %1916 = vmatprep.subr.bf16.mxu1 %v2615_v9 }
 0x1fa   :  { %1917 = vmatpush3.bf16.msra.mxu1 %v2156_v37 }
 0x1fb   :  { %1918 = vmatprep.subr.bf16.mxu1 %v2615_v9 }
 0x1fe   :  { %1919 = vmatpush3.bf16.msra.mxu1 %v2157_v38 }
 0x1ff   :  { %1920 = vmatprep.subr.bf16.mxu1 %v2615_v9 }
 0x202   :  { %1921 = vmatpush3.bf16.msra.mxu1 %v2158_v39 }
 0x203   :  { %1922 = vmatprep.subr.bf16.mxu1 %v2615_v9 }
 0x206   :  { %1923 = vmatpush3.bf16.msra.mxu1 %v2159_v40 }
 0x207   :  { %1924 = vmatprep.subr.bf16.mxu1 %v2615_v9 }
 0x20a   :  { %1925 = vmatpush3.bf16.msra.mxu1 %v2160_v41 }
 0x20b   :  { %2121 = vmatprep.subr.msk.bf16.mxu1 %vm273_vm0, %v687_v60 }
 0x2c0   :  { %v442_v51 = vpop.f32.mrb[4].mxu1 }
 0x2c1   :  { %v1908_v52 = vpop.f32.mrb[5].mxu1  ;;  %v454_v54 = vadd.f32 %v452_v49, %v442_v51  ;;  %v2179_v49 = vld [vmem:[#allocation19 + $0x50] sm:$0xff]   ;;  %v2181_v51 = vld [vmem:[#allocation19 + $0x60] sm:$0xff]  }
 0x2c2   :  { %v445_v53 = vpop.f32.mrb[6].mxu1  ;;  %v2182_v52 = vld [vmem:[#allocation19 + $0x68] sm:$0xff]  }
 0x2c3   :  { %v455_v55 = vadd.f32 %v453_v50, %v445_v53  ;;  %v1909_v56 = vpop.f32.mrb[7].mxu1  ;;  %v2180_v50 = vld [vmem:[#allocation19 + $0x58] sm:$0xff]   ;;  %v847_v53 = vstv %s846_s4 }
 0x2c5   :  { %v456_v57 = vpack.c.bf16 %v455_v55, %v454_v54 }
 0x2c7   :  { %1927 = vmatmul.mubr.bf16.vlgmr.msra.gmra.mrb[8].mxu1 %v456_v57 }
 0x2c8   :  { %1952 = vmatprep.mubr.msk.bf16.mxu1 %vm266_vm1, %v2914_v5  ;;  %1951 = vmatpush3.bf16.msra.mxu1 %v697_v61 }
 0x2cf   :  { %1953 = vmatmul.mubr.msk.bf16.vlgmr.msra.gmra.mrb[12].mxu1 %vm266_vm1, %v2916_v6 }
 0x2d0   :  { %1958 = vmatprep.mubr.msk.bf16.mxu1 %vm337_vm2, %v2920_v7 }
 0x39a   :  { %v562_v63 = vpop.f32.mrb[8].mxu1 }
 0x39b   :  { %v563_v0 = vadd.f32 %v1720_v62, %v562_v63  ;;  %v1928_v1 = vpop.f32.mrb[9].mxu1  ;;  %v2183_v63 = vld [vmem:[#allocation19 + $0x70] sm:$0xff]  }
 0x39c   :  { %v565_v2 = vpop.f32.mrb[10].mxu1  ;;  %v1087_v1 = vld [vmem:[#allocation13 + $0x8] sm:$0xf] }
 0x39d   :  { %v566_v3 = vadd.f32 %v1720_v62, %v565_v2  ;;  %v1929_v4 = vpop.f32.mrb[11].mxu1  ;;  %v569_v10 = vmax.f32 %v563_v0, 0.0  ;;  %v2184_v0 = vld [vmem:[#allocation19 + $0x78] sm:$0xff]   ;;  %v1097_v2 = vsel %vm273_vm0, %v1087_v1, 0 }
 0x39f   :  { %v570_v11 = vmax.f32 %v566_v3, 0.0 }
 0x3a1   :  { %v571_v12 = vpack.c.bf16 %v570_v11, %v569_v10 }
 0x3a3   :  { %1947 = vmatmul.mubr.bf16.vlgmr.msra.gmra.mrb[4].mxu0 %v571_v12 }
 0x3a4   :  { %1986 = vmatprep.mubr.msk.bf16.mxu0 %vm2616_vm3, %v2615_v9  ;;  %1971 = vmatpush3.bf16.msra.mxu0 %v2169_v23 }
 0x3a5   :  { %1972 = vmatprep.subr.bf16.mxu0 %v2615_v9 }
 0x3a8   :  { %1973 = vmatpush3.bf16.msra.mxu0 %v2170_v24 }
 0x3a9   :  { %1974 = vmatprep.subr.bf16.mxu0 %v2615_v9 }
 0x3ac   :  { %1975 = vmatpush3.bf16.msra.mxu0 %v2171_v25  ;;  %v1763_v25 = vld [vmem:[#allocation15 + $0x2] ss:$0 sm:$0xff] }
 0x3ad   :  { %1976 = vmatprep.subr.bf16.mxu0 %v2615_v9 }
 0x3b0   :  { %1977 = vmatpush3.bf16.msra.mxu0 %v2172_v26 }
 0x3b1   :  { %1978 = vmatprep.subr.bf16.mxu0 %v2615_v9 }
 0x3b4   :  { %1979 = vmatpush3.bf16.msra.mxu0 %v2173_v27 }
 0x3b5   :  { %1980 = vmatprep.subr.bf16.mxu0 %v2615_v9 }
 0x3b8   :  { %1981 = vmatpush3.bf16.msra.mxu0 %v2174_v28 }
 0x3b9   :  { %1982 = vmatprep.subr.bf16.mxu0 %v2615_v9 }
 0x3bc   :  { %1983 = vmatpush3.bf16.msra.mxu0 %v2175_v45  ;;  %v2191_v45 = vld [vmem:[#allocation16 + $0xb0] sm:$0xff]  }
 0x3bd   :  { %1984 = vmatprep.subr.bf16.mxu0 %v2615_v9 }
 0x3c0   :  { %1985 = vmatpush3.bf16.msra.mxu0 %v2176_v46  ;;  %v2192_v46 = vld [vmem:[#allocation16 + $0xb8] sm:$0xff]  }
 0x3c1   :  { %2122 = vmatprep.subr.msk.bf16.mxu0 %vm273_vm0, %v1087_v1  ;;  %v1770_v1 = vld [vmem:[#allocation18 + $0x2] ss:$0 sm:$0xff] }
 0x476   :  { %v677_v14 = vpop.f32.mrb[4].mxu0 }
 0x477   :  { %v2971_v15 = vadd.f32 %v1729_v13, %v677_v14  ;;  %v1948_v16 = vpop.f32.mrb[5].mxu0 }
 0x478   :  { %v680_v17 = vpop.f32.mrb[6].mxu0 }
 0x479   :  { %v2973_v18 = vadd.f32 %v1729_v13, %v680_v17  ;;  %v1949_v19 = vpop.f32.mrb[7].mxu0  ;;  %v684_v20 = vmax.f32 %v2971_v15, 0.0  ;;  %v1754_v17 = vld [vmem:[#allocation21 + $0x1] ss:$0 sm:$0xff] }
 0x47b   :  { %v685_v21 = vmax.f32 %v2973_v18, 0.0  ;;  %v848_v54 = vmul.f32 %v847_v53, %v684_v20 }
 0x47d   :  { %v748_v22 = vpack.c.bf16 %v685_v21, %v684_v20  ;;  %v849_v58 = vmul.f32 %v847_v53, %v685_v21  ;;  %v1247_v53 = vstv %s1246_s23 }
 0x47f   :  { %1956 = vmatprep.subr.bf16.mxu1 %v748_v22 }
 0x480   :  { %1957 = vmatpush3.bf16.msra.mxu1 %v748_v22 }
 0x481   :  { %1962 = vmatprep.subr.bf16.mxu1 %v2615_v9 }
 0x483   :  { %1959 = vmatmul.mubr.msk.bf16.vlgmr.msra.gmra.mrb[12].mxu1 %vm337_vm2, %v2922_v8 }
 0x484   :  { %1966 = vmatprep.mubr.msk.bf16.mxu1 %vm2616_vm3, %v2615_v9 }
 0x556   :  { %v1960_v30 = vpop.f32.mrb[12].mxu1 }
 0x557   :  { %v2104_v31 = vadd.f32 %v1960_v30, %v1738_v29  ;;  %v783_v32 = vpop.f32.mrb[13].mxu1 }
 0x558   :  { %v2105_v34 = vadd.f32 %v1738_v29, %v783_v32  ;;  %v1961_v35 = vpop.f32.mrb[14].mxu1 }
 0x559   :  { %v2106_v36 = vadd.f32 %v1961_v35, %v1738_v29  ;;  %v786_v37 = vpop.f32.mrb[15].mxu1  ;;  %v800_v39 = vmax.f32 %v2104_v31, 0.0 }
 0x55a   :  { %v2107_v38 = vadd.f32 %v1738_v29, %v786_v37  ;;  %v798_v41 = vmax.f32 %v2105_v34, 0.0 }
 0x55b   :  { %v801_v40 = vmax.f32 %v2106_v36, 0.0 }
 0x55c   :  { %v799_v42 = vmax.f32 %v2107_v38, 0.0 }
 0x55d   :  { %v803_v43 = vpack.c.bf16 %v801_v40, %v800_v39 }
 0x55e   :  { %v802_v44 = vpack.c.bf16 %v799_v42, %v798_v41  ;;  %v2186_v41 = vld [vmem:[#allocation16 + $0x88] sm:$0xff]   ;;  %v2187_v42 = vld [vmem:[#allocation16 + $0x90] sm:$0xff]  }
 0x560   :  { %1963 = vmatpush3.bf16.msra.mxu1 %v802_v44  ;;  %v2189_v44 = vld [vmem:[#allocation16 + $0xa0] sm:$0xff]  }
 0x561   :  { %1964 = vmatprep.subr.bf16.mxu1 %v2615_v9 }
 0x564   :  { %1965 = vmatpush3.bf16.msra.mxu1 %v803_v43  ;;  %v2188_v43 = vld [vmem:[#allocation16 + $0x98] sm:$0xff]  }
 0x565   :  { %1990 = vmatprep.subr.bf16.mxu1 %v2615_v9 }
 0x567   :  { %1967 = vmatmul.mubr.msk.bf16.vlgmr.msra.gmra.mrb[16].mxu1 %vm404_vm4, %v2937_v33 }
 0x568   :  { %2006 = vmatprep.mubr.msk.bf16.mxu1 %vm2616_vm3, %v2615_v9  ;;  %1991 = vmatpush3.bf16.msra.mxu1 %v2177_v47  ;;  %v2193_v47 = vld [vmem:[#allocation19 + $0x80] sm:$0xff]  }
 0x569   :  { %1992 = vmatprep.subr.bf16.mxu1 %v2615_v9 }
 0x56c   :  { %1993 = vmatpush3.bf16.msra.mxu1 %v2178_v48  ;;  %v2194_v48 = vld [vmem:[#allocation19 + $0x88] sm:$0xff]  }
 0x56d   :  { %1994 = vmatprep.subr.bf16.mxu1 %v2615_v9 }
 0x570   :  { %1995 = vmatpush3.bf16.msra.mxu1 %v2179_v49  ;;  %v2195_v49 = vld [vmem:[#allocation19 + $0x90] sm:$0xff]  }
 0x571   :  { %1996 = vmatprep.subr.bf16.mxu1 %v2615_v9 }
 0x574   :  { %1997 = vmatpush3.bf16.msra.mxu1 %v2180_v50  ;;  %v2196_v50 = vld [vmem:[#allocation19 + $0x98] sm:$0xff]  }
 0x575   :  { %1998 = vmatprep.subr.bf16.mxu1 %v2615_v9 }
 0x578   :  { %1999 = vmatpush3.bf16.msra.mxu1 %v2181_v51  ;;  %v2197_v51 = vld [vmem:[#allocation19 + $0xa0] sm:$0xff]  }
 0x579   :  { %2000 = vmatprep.subr.bf16.mxu1 %v2615_v9 }
 0x57c   :  { %2001 = vmatpush3.bf16.msra.mxu1 %v2182_v52  ;;  %v2198_v52 = vld [vmem:[#allocation19 + $0xa8] sm:$0xff]  }
 0x57d   :  { %2002 = vmatprep.subr.bf16.mxu1 %v2615_v9 }
 0x580   :  { %2003 = vmatpush3.bf16.msra.mxu1 %v2183_v63  ;;  %v2199_v63 = vld [vmem:[#allocation19 + $0xb0] sm:$0xff]  }
 0x581   :  { %2004 = vmatprep.subr.bf16.mxu1 %v2615_v9 }
 0x584   :  { %2005 = vmatpush3.bf16.msra.mxu1 %v2184_v0  ;;  %v2200_v0 = vld [vmem:[#allocation19 + $0xb8] sm:$0xff]  }
 0x585   :  { %2022 = vmatprep.subr.bf16.mxu1 %v2615_v9 }
 0x63a   :  { %v838_v55 = vpop.f32.mrb[16].mxu1 }
 0x63b   :  { %v850_v56 = vadd.f32 %v848_v54, %v838_v55  ;;  %v1968_v57 = vpop.f32.mrb[17].mxu1 }
 0x63c   :  { %v841_v59 = vpop.f32.mrb[18].mxu1 }
 0x63d   :  { %v851_v60 = vadd.f32 %v849_v58, %v841_v59  ;;  %v1969_v61 = vpop.f32.mrb[19].mxu1 }
 0x63f   :  { %v852_v62 = vpack.c.bf16 %v851_v60, %v850_v56 }
 0x641   :  { %1987 = vmatmul.mubr.bf16.vlgmr.msra.gmra.mrb[8].mxu0 %v852_v62 }
 0x642   :  { %2012 = vmatprep.mubr.msk.bf16.mxu0 %vm266_vm1, %v2914_v5  ;;  %2011 = vmatpush3.bf16.msra.mxu0 %v1097_v2  ;;  %v1745_v5 = vld [vmem:[#allocation18 + $0x1] ss:$0 sm:$0xff] }
 0x649   :  { %2013 = vmatmul.mubr.msk.bf16.vlgmr.msra.gmra.mrb[12].mxu0 %vm266_vm1, %v2916_v6 }
 0x64a   :  { %2018 = vmatprep.mubr.msk.bf16.mxu0 %vm337_vm2, %v2920_v7 }
 0x714   :  { %v960_v3 = vpop.f32.mrb[8].mxu0 }
 0x715   :  { %v961_v4 = vadd.f32 %v1745_v5, %v960_v3  ;;  %v1988_v10 = vpop.f32.mrb[9].mxu0 }
 0x716   :  { %v963_v11 = vpop.f32.mrb[10].mxu0 }
 0x717   :  { %v964_v12 = vadd.f32 %v1745_v5, %v963_v11  ;;  %v1989_v13 = vpop.f32.mrb[11].mxu0  ;;  %v967_v14 = vmax.f32 %v961_v4, 0.0 }
 0x719   :  { %v968_v15 = vmax.f32 %v964_v12, 0.0 }
 0x71b   :  { %v969_v16 = vpack.c.bf16 %v968_v15, %v967_v14  ;;  %v2201_v15 = vld [vmem:[#allocation22] sm:$0xff]  }
 0x71d   :  { %2007 = vmatmul.mubr.bf16.vlgmr.msra.gmra.mrb[20].mxu1 %v969_v16  ;;  %v2202_v16 = vld [vmem:[#allocation22 + $0x8] sm:$0xff]  }
 0x71e   :  { %2026 = vmatprep.mubr.msk.bf16.mxu1 %vm2616_vm3, %v2615_v9 }
 0x7f0   :  { %v1077_v18 = vpop.f32.mrb[20].mxu1 }
 0x7f1   :  { %v3021_v6 = vadd.f32 %v1754_v17, %v1077_v18  ;;  %v2008_v19 = vpop.f32.mrb[21].mxu1  ;;  %v2204_v18 = vld [vmem:[#allocation22 + $0x18] sm:$0xff]  }
 0x7f2   :  { %v1080_v7 = vpop.f32.mrb[22].mxu1  ;;  %v2206_v19 = vld [vmem:[#allocation22 + $0x28] sm:$0xff]  }
 0x7f3   :  { %v3023_v20 = vadd.f32 %v1754_v17, %v1080_v7  ;;  %v2009_v21 = vpop.f32.mrb[23].mxu1  ;;  %v1084_v22 = vmax.f32 %v3021_v6, 0.0  ;;  %v2203_v17 = vld [vmem:[#allocation22 + $0x10] sm:$0xff]   ;;  %v2205_v6 = vld [vmem:[#allocation22 + $0x20] sm:$0xff]  }
 0x7f4   :  { %v2207_v7 = vld [vmem:[#allocation22 + $0x30] sm:$0xff]  }
 0x7f5   :  { %v1085_v23 = vmax.f32 %v3023_v20, 0.0  ;;  %v1248_v54 = vmul.f32 %v1247_v53, %v1084_v22  ;;  %v1779_v20 = vld [vmem:[#allocation21 + $0x2] ss:$0 sm:$0xff] }
 0x7f7   :  { %v1148_v24 = vpack.c.bf16 %v1085_v23, %v1084_v22  ;;  %v1249_v58 = vmul.f32 %v1247_v53, %v1085_v23 }
 0x7f9   :  { %2016 = vmatprep.subr.bf16.mxu0 %v1148_v24 }
 0x7fa   :  { %2017 = vmatpush3.bf16.msra.mxu0 %v1148_v24 }
 0x7fb   :  { %2050 = vmatprep.subr.bf16.mxu0 %v2615_v9 }
 0x7fd   :  { %2019 = vmatmul.mubr.msk.bf16.vlgmr.msra.gmra.mrb[12].mxu0 %vm337_vm2, %v2922_v8  ;;  %v2185_v8 = vld [vmem:[#allocation16 + $0x80] sm:$0xff]  }
 0x7fe   :  { %2066 = vmatprep.mubr.msk.bf16.mxu0 %vm2616_vm3, %v2615_v9  ;;  %2051 = vmatpush3.bf16.msra.mxu0 %v2193_v47 }
 0x7ff   :  { %2052 = vmatprep.subr.bf16.mxu0 %v2615_v9 }
 0x802   :  { %2053 = vmatpush3.bf16.msra.mxu0 %v2194_v48 }
 0x803   :  { %2054 = vmatprep.subr.bf16.mxu0 %v2615_v9 }
 0x806   :  { %2055 = vmatpush3.bf16.msra.mxu0 %v2195_v49 }
 0x807   :  { %2056 = vmatprep.subr.bf16.mxu0 %v2615_v9 }
 0x80a   :  { %2057 = vmatpush3.bf16.msra.mxu0 %v2196_v50 }
 0x80b   :  { %2058 = vmatprep.subr.bf16.mxu0 %v2615_v9 }
 0x80e   :  { %2059 = vmatpush3.bf16.msra.mxu0 %v2197_v51 }
 0x80f   :  { %2060 = vmatprep.subr.bf16.mxu0 %v2615_v9 }
 0x812   :  { %2061 = vmatpush3.bf16.msra.mxu0 %v2198_v52 }
 0x813   :  { %2062 = vmatprep.subr.bf16.mxu0 %v2615_v9 }
 0x816   :  { %2063 = vmatpush3.bf16.msra.mxu0 %v2199_v63 }
 0x817   :  { %2064 = vmatprep.subr.bf16.mxu0 %v2615_v9 }
 0x81a   :  { %2065 = vmatpush3.bf16.msra.mxu0 %v2200_v0 }
 0x81b   :  { %2076 = vmatprep.subr.bf16.mxu0 %v2615_v9 }
 0x8d0   :  { %v2020_v26 = vpop.f32.mrb[12].mxu0 }
 0x8d1   :  { %v2108_v27 = vadd.f32 %v2020_v26, %v1763_v25  ;;  %v1183_v28 = vpop.f32.mrb[13].mxu0 }
 0x8d2   :  { %v2109_v29 = vadd.f32 %v1763_v25, %v1183_v28  ;;  %v2021_v30 = vpop.f32.mrb[14].mxu0  ;;  %v1486_v28 = vld [vmem:[#allocation12] sm:$0x1] }
 0x8d3   :  { %v2110_v31 = vadd.f32 %v2021_v30, %v1763_v25  ;;  %v1186_v32 = vpop.f32.mrb[15].mxu0  ;;  %v1200_v35 = vmax.f32 %v2108_v27, 0.0 }
 0x8d4   :  { %v2111_v34 = vadd.f32 %v1763_v25, %v1186_v32  ;;  %v1198_v37 = vmax.f32 %v2109_v29, 0.0  ;;  %v2208_v29 = vld [vmem:[#allocation22 + $0x38] sm:$0xff]  }
 0x8d5   :  { %v1201_v36 = vmax.f32 %v2110_v31, 0.0 }
 0x8d6   :  { %v1199_v38 = vmax.f32 %v2111_v34, 0.0 }
 0x8d7   :  { %v1203_v39 = vpack.c.bf16 %v1201_v36, %v1200_v35  ;;  %v1789_v35 = vld [vmem:[#allocation24] ss:$0 sm:$0xff] }
 0x8d8   :  { %v1202_v40 = vpack.c.bf16 %v1199_v38, %v1198_v37 }
 0x8da   :  { %2023 = vmatpush3.bf16.msra.mxu1 %v1202_v40 }
 0x8db   :  { %2024 = vmatprep.subr.bf16.mxu1 %v2615_v9 }
 0x8de   :  { %2025 = vmatpush3.bf16.msra.mxu1 %v1203_v39 }
 0x8df   :  { %2030 = vmatprep.subr.bf16.mxu1 %v2615_v9 }
 0x8e1   :  { %2027 = vmatmul.mubr.msk.bf16.vlgmr.msra.gmra.mrb[24].mxu1 %vm404_vm4, %v2937_v33  ;;  %v2190_v33 = vld [vmem:[#allocation16 + $0xa8] sm:$0xff]  }
 0x8e2   :  { %2031 = vmatpush3.bf16.msra.mxu1 %v2185_v8  ;;  %2046 = vmatprep.mubr.msk.bf16.mxu1 %vm2616_vm3, %v2615_v9 }
 0x8e3   :  { %2032 = vmatprep.subr.bf16.mxu1 %v2615_v9 }
 0x8e6   :  { %2033 = vmatpush3.bf16.msra.mxu1 %v2186_v41 }
 0x8e7   :  { %2034 = vmatprep.subr.bf16.mxu1 %v2615_v9 }
 0x8ea   :  { %2035 = vmatpush3.bf16.msra.mxu1 %v2187_v42 }
 0x8eb   :  { %2036 = vmatprep.subr.bf16.mxu1 %v2615_v9 }
 0x8ee   :  { %2037 = vmatpush3.bf16.msra.mxu1 %v2188_v43 }
 0x8ef   :  { %2038 = vmatprep.subr.bf16.mxu1 %v2615_v9 }
 0x8f2   :  { %2039 = vmatpush3.bf16.msra.mxu1 %v2189_v44 }
 0x8f3   :  { %2040 = vmatprep.subr.bf16.mxu1 %v2615_v9 }
 0x8f6   :  { %2041 = vmatpush3.bf16.msra.mxu1 %v2190_v33 }
 0x8f7   :  { %2042 = vmatprep.subr.bf16.mxu1 %v2615_v9 }
 0x8fa   :  { %2043 = vmatpush3.bf16.msra.mxu1 %v2191_v45 }
 0x8fb   :  { %2044 = vmatprep.subr.bf16.mxu1 %v2615_v9 }
 0x8fe   :  { %2045 = vmatpush3.bf16.msra.mxu1 %v2192_v46 }
 0x8ff   :  { %2070 = vmatprep.subr.bf16.mxu1 %v2615_v9 }
 0x9b4   :  { %v1238_v55 = vpop.f32.mrb[24].mxu1 }
 0x9b5   :  { %v1250_v56 = vadd.f32 %v1248_v54, %v1238_v55  ;;  %v2028_v57 = vpop.f32.mrb[25].mxu1 }
 0x9b6   :  { %v1241_v59 = vpop.f32.mrb[26].mxu1 }
 0x9b7   :  { %v1251_v60 = vadd.f32 %v1249_v58, %v1241_v59  ;;  %v2029_v61 = vpop.f32.mrb[27].mxu1 }
 0x9b9   :  { %v1252_v62 = vpack.c.bf16 %v1251_v60, %v1250_v56 }
 0x9bb   :  { %2047 = vmatmul.mubr.bf16.vlgmr.msra.gmra.mrb[28].mxu1 %v1252_v62 }
 0x9bc   :  { %2072 = vmatprep.mubr.msk.bf16.mxu1 %vm2616_vm3, %v2615_v9 }
 0xa8e   :  { %v1360_v2 = vpop.f32.mrb[28].mxu1 }
 0xa8f   :  { %v1361_v5 = vadd.f32 %v1770_v1, %v1360_v2  ;;  %v2048_v3 = vpop.f32.mrb[29].mxu1 }
 0xa90   :  { %v1363_v4 = vpop.f32.mrb[30].mxu1 }
 0xa91   :  { %v1364_v10 = vadd.f32 %v1770_v1, %v1363_v4  ;;  %v2049_v11 = vpop.f32.mrb[31].mxu1  ;;  %v1367_v12 = vmax.f32 %v1361_v5, 0.0 }
 0xa93   :  { %v1368_v13 = vmax.f32 %v1364_v10, 0.0 }
 0xa95   :  { %v1369_v14 = vpack.c.bf16 %v1368_v13, %v1367_v12 }
 0xa97   :  { %2067 = vmatmul.mubr.bf16.vlgmr.msra.gmra.mrb[16].mxu0 %v1369_v14 }
 0xa98   :  { %2092 = vmatprep.mubr.msk.bf16.mxu0 %vm2616_vm3, %v2615_v9  ;;  %2077 = vmatpush3.bf16.msra.mxu0 %v2201_v15 }
 0xa99   :  { %2078 = vmatprep.subr.bf16.mxu0 %v2615_v9 }
 0xa9c   :  { %2079 = vmatpush3.bf16.msra.mxu0 %v2202_v16 }
 0xa9d   :  { %2080 = vmatprep.subr.bf16.mxu0 %v2615_v9 }
 0xaa0   :  { %2081 = vmatpush3.bf16.msra.mxu0 %v2203_v17 }
 0xaa1   :  { %2082 = vmatprep.subr.bf16.mxu0 %v2615_v9 }
 0xaa4   :  { %2083 = vmatpush3.bf16.msra.mxu0 %v2204_v18 }
 0xaa5   :  { %2084 = vmatprep.subr.bf16.mxu0 %v2615_v9 }
 0xaa8   :  { %2085 = vmatpush3.bf16.msra.mxu0 %v2205_v6 }
 0xaa9   :  { %2086 = vmatprep.subr.bf16.mxu0 %v2615_v9 }
 0xaac   :  { %2087 = vmatpush3.bf16.msra.mxu0 %v2206_v19 }
 0xaad   :  { %2088 = vmatprep.subr.bf16.mxu0 %v2615_v9 }
 0xab0   :  { %2089 = vmatpush3.bf16.msra.mxu0 %v2207_v7 }
 0xab1   :  { %2090 = vmatprep.subr.bf16.mxu0 %v2615_v9 }
 0xab4   :  { %2091 = vmatpush3.bf16.msra.mxu0 %v2208_v29 }
 0xb6a   :  { %v1477_v21 = vpop.f32.mrb[16].mxu0 }
 0xb6b   :  { %v1478_v22 = vadd.f32 %v1779_v20, %v1477_v21  ;;  %v2068_v23 = vpop.f32.mrb[17].mxu0 }
 0xb6c   :  { %v1480_v24 = vpop.f32.mrb[18].mxu0 }
 0xb6d   :  { %1484 = vst [vmem:[#allocation28] sm:$0xff] %v1478_v22  ;;  %v1481_v25 = vadd.f32 %v1779_v20, %v1480_v24  ;;  %v2069_v26 = vpop.f32.mrb[19].mxu0 }
 0xb6f   :  { %1485 = vst [vmem:[#allocation28 + $0x8] sm:$0xff] %v1481_v25  ;;  %v1487_v27 = vpack.c.bf16 %v1481_v25, %v1478_v22 }
 0xb71   :  { %2071 = vmatpush3.bf16.msra.mxu1 %v1487_v27 }
 0xb74   :  { %2073 = vmatmul.mubr.msk.bf16.vlgmr.msra.gmra.mrb[32].mxu1 %vm337_vm2, %v1486_v28 }
 0xc47   :  { %v1525_v30 = vpop.f32.mrb[32].mxu1 }
 0xc48   :  { %v1532_v31 = vpack.c.bf16 %v1525_v30, %v1525_v30  ;;  %1531 = vst [vmem:[#allocation26] sm:$0x3] %v1525_v30  ;;  %v2074_v9 = vpop.f32.mrb[33].mxu1 }
 0xc49   :  { %v1528_v32 = vpop.f32.mrb[34].mxu1 }
 0xc4a   :  { %2093 = vmatmul.mubr.bf16.vlgmr.msra.gmra.mrb[20].mxu0 %v1532_v31  ;;  %v2075_v34 = vpop.f32.mrb[35].mxu1 }
 0xd1d   :  { %v1638_v36 = vpop.f32.mrb[20].mxu0 }
 0xd1e   :  { %v1639_v37 = vadd.f32 %v1789_v35, %v1638_v36  ;;  %v2094_v38 = vpop.f32.mrb[21].mxu0 }
 0xd1f   :  { %v1641_v39 = vpop.f32.mrb[22].mxu0 }
 0xd20   :  { %v1645_v40 = vsel %vm1644_vm5, %v1639_v37, -inf  ;;  %v2095_v8 = vpop.f32.mrb[23].mxu0 }
 0xd21   :  { %1646 = vmax.xlane.f32.xlu0 %v1645_v40 }
 0xdae   :  { %v1647_v41 = vpop.xlane.xlu0 %1646 }
 0xdaf   :  { %v1648_v42 = vsub.f32 %v1639_v37, %v1647_v41 }
 0xdb1   :  { %v1649_v43 = vmul.f32 1.442695, %v1648_v42 }
 0xdb3   :  { %2209 = vpow2.f32 %v1649_v43 }
 0xdbd   :  { %v2210_v44 = vpop.eup %2209 }
 0xdbe   :  { %v1651_v33 = vsel %vm1644_vm5, %v2210_v44, 0.0 }
 0xdbf   :  { %1652 = vadd.xlane.f32.xlu0 %v1651_v33 }
 0xdc0   :  { %2520 = shalt.err (!%p2517_p13)
}
 0xdc1   :  { %s2521_s8 = scalar_lea.hbm %s3128_s15, 32 }
 0xdc2   :  { %p2522_p0 = scmp.ne.s32.totalorder %s3128_s15, %s2521_s8  ;;  %p2525_p1 = scmp.lt.u32.totalorder %s2521_s8, %s3128_s15 }
 0xdc4   :  { %p2527_p2 = pnand %p2525_p1, %p2522_p0 }
 0xdc6   :  { %2530 = shalt.err (!%p2527_p2)
}
 0xdc7   :  { %1677 = dma.vmem_to_hbm [thread:$0]  %s1675_s5, 32, %s3128_s15, [#allocation27]  }
 0xdc8   :  { %s2618_s17 = smov [#allocation28]  }
 0xdc9   :  { %s1683_s12 = sshll.u32 %s2618_s17, 4  ;;  %s1684_s12 = int_to_ptr.vmem [resolvable:$true] %s1683_s12 }
 0xdca   :  { %s2531_s24 = scalar_lea.vmem %s1684_s12, 256  ;;  %p2536_p4 = scmp.lt.s32.totalorder %s1684_s12, %s1684_s12 }
 0xdcb   :  { %p2532_p3 = scmp.ne.s32.totalorder %s1684_s12, %s2531_s24  ;;  %p2537_p5 = scmp.lt.s32.totalorder %s2531_s24, %s2531_s24 }
 0xdcd   :  { %p2538_p6 = por %p2537_p5, %p2536_p4 }
 0xdcf   :  { %p2539_p7 = pnand %p2538_p6, %p2532_p3 }
 0xdd1   :  { %2542 = shalt.err (!%p2539_p7)
}
 0xdd2   :  { %s2543_s27 = scalar_lea.hbm %s3129_s16, 256 }
 0xdd3   :  { %p2544_p8 = scmp.ne.s32.totalorder %s3129_s16, %s2543_s27  ;;  %p2547_p9 = scmp.lt.u32.totalorder %s2543_s27, %s3129_s16 }
 0xdd5   :  { %p2549_p10 = pnand %p2547_p9, %p2544_p8 }
 0xdd7   :  { %2552 = shalt.err (!%p2549_p10)
}
 0xdd8   :  { %1689 = dma.vmem_to_hbm [thread:$0]  %s1684_s12, 256, %s3129_s16, [#allocation27], %s2605_s2, %s2605_s2, %s2606_s18  }
 0xdd9   :  { %s2619_s28 = smov [#allocation25]  }
 0xdda   :  { %s1664_s4 = sshll.u32 %s2619_s28, 4  ;;  %s1665_s4 = int_to_ptr.vmem [resolvable:$true] %s1664_s4 }
 0xddb   :  { %s2553_s1 = scalar_lea.vmem %s1665_s4, 32  ;;  %p2558_p12 = scmp.lt.s32.totalorder %s1665_s4, %s1665_s4 }
 0xddc   :  { %p2554_p11 = scmp.ne.s32.totalorder %s1665_s4, %s2553_s1  ;;  %p2559_p13 = scmp.lt.s32.totalorder %s2553_s1, %s2553_s1 }
 0xdde   :  { %p2560_p0 = por %p2559_p13, %p2558_p12 }
 0xde0   :  { %p2561_p1 = pnand %p2560_p0, %p2554_p11 }
 0xe4c   :  { %v1653_v45 = vpop.xlane.xlu0 %1652 }
 0xe4d   :  { %2211 = vlog2.f32 %v1653_v45 }
 0xe57   :  { %v2212_v46 = vpop.eup %2211 }
 0xe58   :  { %v1655_v47 = vmul.f32 0.6931472, %v2212_v46 }
 0xe5a   :  { %v1656_v48 = vsub.f32 %v1648_v42, %v1655_v47 }
 0xe5c   :  { %1657 = vst [vmem:[#allocation25] sm:$0x3] %v1656_v48 }
 0xe5d   :  { %2564 = shalt.err (!%p2561_p1)
}
 0xe5e   :  { %s3135_s5 = sld [smem:[#allocation40_spill]] }
 0xe64   :  { %s2565_s16 = scalar_lea.hbm %s3135_s5, 32 }
 0xe65   :  { %p2566_p2 = scmp.ne.s32.totalorder %s3135_s5, %s2565_s16  ;;  %p2569_p3 = scmp.lt.u32.totalorder %s2565_s16, %s3135_s5 }
 0xe67   :  { %p2571_p4 = pnand %p2569_p3, %p2566_p2 }
 0xe69   :  { %2574 = shalt.err (!%p2571_p4)
}
 0xe6a   :  { %1667 = dma.vmem_to_hbm [thread:$0]  %s1665_s4, 32, %s3135_s5, [#allocation4]  }
 0xe6b   :  { %2591 = dma.done.wait [#allocation4], 32  }
 0xe6c   :  { %2592 = vsyncadd [#allocation4], 4294967264 }
 0xe6d   :  { %2593 = dma.done.wait [#allocation27], 288  }
 0xe6e   :  { %2594 = vsyncadd [#allocation27], 4294967008 }
 0xe6f   :  { %1699 = vsyncpa [#allocation3], 1 }
 0xe70   :  { %1700 = vsyncpa [#allocation8], 1 }
 0xe71   :  { %1701 = vsyncpa [#allocation11], 1 }
 0xe72   :  { %1702 = vsyncpa [#allocation14], 1 }
 0xe73   :  { %1703 = vsyncpa [#allocation17], 1 }
 0xe74   :  { %1704 = vsyncpa [#allocation20], 1 }
 0xe75   :  { %1705 = vsyncpa [#allocation23], 1 }
 0xe76   :  { %1706 = vsyncpa [#allocation4], 1 }
 0xe77   :  { %1707 = vsyncpa [#allocation27], 1 }
 0xe78   :  { %1708 = vsyncpa [#allocation5], 1 }

</bundles_post_ra>
